<compile_context>
chip_gen: v5e
topology: v5e:2x2
jax: 0.10.0
libtpu: 0.0.40
codegen_flags: <defaults>
</compile_context>

<pallas_src>
import jax
import jax.numpy as jnp
from jax.experimental import pallas as pl
from jax.experimental.pallas import tpu as pltpu

NUM_CATEGORIES = 22
FEATURES = 1000            # pretrained_model output width (ImageNet-style 1000 logits)

FEATURES_PAD = 1024        # 1000 -> 1024 (lane-dense)
OUT_PAD = 128              # 22   -> 128  (lane-dense, unmasked vst)

N_SPLIT = 2                        # independent feature halves -> "parallel" axis (2 TCs on v7x)
TILE_N = FEATURES_PAD // N_SPLIT   # 512 features per half
TILE_K_MAX = 4096                  # 4096 x 512 bf16 = 4 MB w0 block (8 MB double-buffered)


def _round_up(x, m):
    return (x + m - 1) // m * m


def simple_layers_kernel(x_ref, w0_ref, b0_ref, w1_ref, o_ref, feat_acc):
    """One (n, k) grid step.

    n (axis 0, "parallel"): which 512-wide feature half this step owns.
    k (axis 1, "arbitrary"): reduction chunk over the flattened input pixels.
    feat_acc: (B, TILE_N) f32 VMEM scratch, reduced over k.
    o_ref: (1, B, OUT_PAD) partial output for this half (bias b1 added in the wrapper).
    """
    k = pl.program_id(1)

    @pl.when(k == 0)
    def _():
        feat_acc[...] = jnp.zeros_like(feat_acc)

    # Backbone matmul chunk: x[:, k_tile] @ W0[k_tile, n_half]  (bf16 MXU, f32 accumulate).
    feat_acc[...] += jnp.dot(x_ref[...], w0_ref[...],
                             preferred_element_type=jnp.float32)

    # Reduction finished for this half: bias + ReLU, fold through the final Linear slice,
    # single unmasked store of the partial output (no read-modify-write).
    @pl.when(k == pl.num_programs(1) - 1)
    def _():
        feat = jnp.maximum(feat_acc[...] + b0_ref[...], 0.0)
        o_ref[0] = jnp.dot(feat.astype(jnp.bfloat16), w1_ref[...],
                           preferred_element_type=jnp.float32)


def prepare_params(w0, b0, w1, b1):
    """Pad to lane-dense / tile-aligned shapes and cast weights to bf16 ONCE (not per forward).

    w0: [in_features, 1000], b0: [1000], w1: [1000, 22], b1: [22]  (torch weights, transposed).
    """
    K = w0.shape[0]
    tile_k = min(TILE_K_MAX, _round_up(K, 128))
    k_pad = _round_up(K, tile_k)

    w0_p = jnp.pad(w0, ((0, k_pad - K), (0, FEATURES_PAD - FEATURES))).astype(jnp.bfloat16)
    b0_p = jnp.pad(b0.reshape(1, -1),
                   ((0, 0), (0, FEATURES_PAD - FEATURES))).astype(jnp.float32)
    w1_p = jnp.pad(w1, ((0, FEATURES_PAD - FEATURES),
                        (0, OUT_PAD - NUM_CATEGORIES))).astype(jnp.bfloat16)
    b1_p = jnp.pad(b1.reshape(1, -1),
                   ((0, 0), (0, OUT_PAD - NUM_CATEGORIES))).astype(jnp.float32)
    return w0_p, b0_p, w1_p, b1_p


@jax.jit
def simple_layers_forward(x, w0_p, b0_p, w1_p, b1_p):
    """x: [B, C, H, W] f32; pre-padded params from `prepare_params`. Returns [B, 22] f32."""
    B = x.shape[0]
    x_flat = x.reshape(B, -1)                 # NCHW flatten (plain JAX glue)
    K = x_flat.shape[1]
    k_pad = w0_p.shape[0]
    tile_k = min(TILE_K_MAX, k_pad)           # consistent with prepare_params by construction
    num_k = k_pad // tile_k

    # Zero-pad the reduction dim and pre-cast to bf16 (halves the x stream, no in-kernel cast).
    x_p = jnp.pad(x_flat, ((0, 0), (0, k_pad - K))).astype(jnp.bfloat16)

    flops = 2 * B * k_pad * FEATURES_PAD + 2 * B * FEATURES_PAD * OUT_PAD
    bytes_accessed = (N_SPLIT * x_p.size * 2      # x streamed once per feature half
                      + w0_p.size * 2             # w0 streamed exactly once (bf16)
                      + b0_p.size * 4
                      + w1_p.size * 2
                      + N_SPLIT * B * OUT_PAD * 4)

    partials = pl.pallas_call(
        simple_layers_kernel,
        out_shape=jax.ShapeDtypeStruct((N_SPLIT, B, OUT_PAD), jnp.float32),
        grid_spec=pltpu.PrefetchScalarGridSpec(
            num_scalar_prefetch=0,
            grid=(N_SPLIT, num_k),
            in_specs=[
                pl.BlockSpec((B, tile_k), lambda n, k: (0, k)),        # x (bf16)
                pl.BlockSpec((tile_k, TILE_N), lambda n, k: (k, n)),   # w0 half (bf16)
                pl.BlockSpec((1, TILE_N), lambda n, k: (0, n)),        # b0 half
                pl.BlockSpec((TILE_N, OUT_PAD), lambda n, k: (n, 0)),  # w1 half (bf16)
            ],
            out_specs=pl.BlockSpec((1, B, OUT_PAD), lambda n, k: (n, 0, 0)),
            scratch_shapes=[pltpu.VMEM((B, TILE_N), jnp.float32)],
        ),
        compiler_params=pltpu.CompilerParams(
            # Feature halves are independent (own output block) -> safe "parallel" (2 TCs on v7x).
            # Output accumulates across k only -> k stays "arbitrary".
            dimension_semantics=("parallel", "arbitrary"),
            vmem_limit_bytes=32 * 1024 * 1024,
        ),
        cost_estimate=pl.CostEstimate(flops=flops, transcendentals=0,
                                      bytes_accessed=bytes_accessed),
    )(x_p, w0_p, b0_p, w1_p)

    out = partials.sum(axis=0) + b1_p          # combine halves, add final bias (tiny epilogue)
    return out[:, :NUM_CATEGORIES]


def init_params(key, in_features):
    """Deterministic synthetic parameters (PyTorch Linear-style fan-in scaling),
    stored transposed relative to torch's [out, in] so the kernel does x @ W_t."""
    k0, k1, k2, k3 = jax.random.split(key, 4)
    s0 = 1.0 / jnp.sqrt(in_features)
    s1 = 1.0 / jnp.sqrt(FEATURES)
    w0 = jax.random.uniform(k0, (in_features, FEATURES), jnp.float32, -s0, s0)
    b0 = jax.random.uniform(k1, (FEATURES,), jnp.float32, -s0, s0)
    w1 = jax.random.uniform(k2, (FEATURES, NUM_CATEGORIES), jnp.float32, -s1, s1)
    b1 = jax.random.uniform(k3, (NUM_CATEGORIES,), jnp.float32, -s1, s1)
    return w0, b0, w1, b1


def _reference_bf16(x, w0, b0, w1, b1):
    """Reference mirroring the kernel arithmetic (bf16 operands, f32 accumulation)."""
    x_flat = x.reshape(x.shape[0], -1).astype(jnp.bfloat16)
    feat = jnp.maximum(
        jnp.dot(x_flat, w0.astype(jnp.bfloat16),
                preferred_element_type=jnp.float32) + b0[None, :], 0.0)
    return jnp.dot(feat.astype(jnp.bfloat16), w1.astype(jnp.bfloat16),
                   preferred_element_type=jnp.float32) + b1[None, :]


if __name__ == "__main__":
    key = jax.random.PRNGKey(0)
    kx, kp, kx2, kp2 = jax.random.split(key, 4)

    # --- Primary check: small NCHW input (single K step per feature half) -------------------
    B, C, H, W = 2, 4, 16, 16
    x = jax.random.normal(kx, (B, C, H, W), jnp.float32)
    w0, b0, w1, b1 = init_params(kp, C * H * W)
    params = prepare_params(w0, b0, w1, b1)

    out = simple_layers_forward(x, *params)
    out = jax.block_until_ready(out)
    assert out.shape == (B, NUM_CATEGORIES)

    ref_bf16 = _reference_bf16(x, w0, b0, w1, b1)
    assert jnp.allclose(out, ref_bf16, atol=1e-2, rtol=1e-2)

    x_flat = x.reshape(B, -1)
    ref_f32 = jnp.maximum(x_flat @ w0 + b0[None, :], 0.0) @ w1 + b1[None, :]
    assert jnp.allclose(out, ref_f32, atol=5e-2, rtol=5e-2)

    # --- Secondary check: larger in_features exercises the multi-K-step pipelined path ------
    B2, C2, H2, W2 = 2, 8, 32, 32                       # K = 8192 -> 2 K tiles of 4096
    x2 = jax.random.normal(kx2, (B2, C2, H2, W2), jnp.float32)
    w0b, b0b, w1b, b1b = init_params(kp2, C2 * H2 * W2)
    params2 = prepare_params(w0b, b0b, w1b, b1b)

    out2 = jax.block_until_ready(simple_layers_forward(x2, *params2))
    ref2 = _reference_bf16(x2, w0b, b0b, w1b, b1b)
    assert out2.shape == (B2, NUM_CATEGORIES)
    assert jnp.allclose(out2, ref2, atol=1e-2, rtol=1e-2)

    print("KERNEL_OK")
</pallas_src>

<mosaic_0001>
module attributes {stable_mosaic.version = 11 : i64} {
  func.func @simple_layers_kernel(%arg0: i32, %arg1: i32, %arg2: memref<2x1024xbf16, #tpu.memory_space<vmem>>, %arg3: memref<1024x512xbf16, #tpu.memory_space<vmem>>, %arg4: memref<1x512xf32, #tpu.memory_space<vmem>>, %arg5: memref<512x128xbf16, #tpu.memory_space<vmem>>, %arg6: memref<1x2x128xf32, #tpu.memory_space<vmem>>, %arg7: memref<2x512xf32, #tpu.memory_space<vmem>>) attributes {dimension_semantics = [#tpu.dimension_semantics<parallel>, #tpu.dimension_semantics<arbitrary>], iteration_bounds = array<i64: 2, 1>, scalar_prefetch = 0 : i64, scratch_operands = 1 : i64, tpu.core_type = #tpu.core_type<tc>, window_params = [{transform_indices = @transform_0, window_bounds = array<i64: 2, 1024>}, {transform_indices = @transform_1, window_bounds = array<i64: 1024, 512>}, {transform_indices = @transform_2, window_bounds = array<i64: 1, 512>}, {transform_indices = @transform_3, window_bounds = array<i64: 512, 128>}, {transform_indices = @transform_4, window_bounds = array<i64: 1, 2, 128>}]} {
    %c0_i32 = arith.constant 0 : i32
    %0 = arith.cmpi eq, %arg1, %c0_i32 : i32
    %1 = arith.extui %0 : i1 to i32
    %c0_i32_0 = arith.constant 0 : i32
    %2 = arith.cmpi ne, %1, %c0_i32_0 : i32
    scf.if %2 {
      %cst_10 = arith.constant 0.000000e+00 : f32
      %12 = vector.broadcast %cst_10 : f32 to vector<2x512xf32>
      %c0_11 = arith.constant 0 : index
      %c0_12 = arith.constant 0 : index
      %13 = vector.load %arg7[%c0_11, %c0_12] : memref<2x512xf32, #tpu.memory_space<vmem>>, vector<2x512xf32>
      tpu.vector_store %arg7[%c0_11, %c0_12], %12 {strides = array<i32>} : memref<2x512xf32, #tpu.memory_space<vmem>>, vector<2x512xf32>,
    } else {
    }
    %c0 = arith.constant 0 : index
    %c0_1 = arith.constant 0 : index
    %3 = vector.load %arg7[%c0, %c0_1] : memref<2x512xf32, #tpu.memory_space<vmem>>, vector<2x512xf32>
    %c0_2 = arith.constant 0 : index
    %c0_3 = arith.constant 0 : index
    %4 = vector.load %arg2[%c0_2, %c0_3] : memref<2x1024xbf16, #tpu.memory_space<vmem>>, vector<2x1024xbf16>
    %c0_4 = arith.constant 0 : index
    %c0_5 = arith.constant 0 : index
    %5 = vector.load %arg3[%c0_4, %c0_5] : memref<1024x512xbf16, #tpu.memory_space<vmem>>, vector<1024x512xbf16>
    %cst = arith.constant dense<0.000000e+00> : vector<2x512xf32>
    %6 = tpu.matmul %4, %5, %cst {dimension_numbers = #tpu.dot_dimension_numbers<[1], [0], [0], [1], [0, 0, 1, 1], [], []>} : vector<2x1024xbf16>, vector<1024x512xbf16>, vector<2x512xf32> -> vector<2x512xf32>
    %7 = arith.addf %3, %6 : vector<2x512xf32>
    %c0_6 = arith.constant 0 : index
    %c0_7 = arith.constant 0 : index
    %8 = vector.load %arg7[%c0_6, %c0_7] : memref<2x512xf32, #tpu.memory_space<vmem>>, vector<2x512xf32>
    tpu.vector_store %arg7[%c0_6, %c0_7], %7 {strides = array<i32>} : memref<2x512xf32, #tpu.memory_space<vmem>>, vector<2x512xf32>,
    %c0_i32_8 = arith.constant 0 : i32
    %9 = arith.cmpi eq, %arg1, %c0_i32_8 : i32
    %10 = arith.extui %9 : i1 to i32
    %c0_i32_9 = arith.constant 0 : i32
    %11 = arith.cmpi ne, %10, %c0_i32_9 : i32
    scf.if %11 {
      %c0_10 = arith.constant 0 : index
      %c0_11 = arith.constant 0 : index
      %12 = vector.load %arg7[%c0_10, %c0_11] : memref<2x512xf32, #tpu.memory_space<vmem>>, vector<2x512xf32>
      %c0_12 = arith.constant 0 : index
      %c0_13 = arith.constant 0 : index
      %13 = vector.load %arg4[%c0_12, %c0_13] : memref<1x512xf32, #tpu.memory_space<vmem>>, vector<1x512xf32>
      %14 = vector.broadcast %13 : vector<1x512xf32> to vector<2x512xf32>
      %15 = arith.addf %12, %14 : vector<2x512xf32>
      %cst_14 = arith.constant 0.000000e+00 : f32
      %16 = vector.broadcast %cst_14 : f32 to vector<2x512xf32>
      %17 = arith.maximumf %15, %16 : vector<2x512xf32>
      %18 = arith.truncf %17 : vector<2x512xf32> to vector<2x512xbf16>
      %c0_15 = arith.constant 0 : index
      %c0_16 = arith.constant 0 : index
      %19 = vector.load %arg5[%c0_15, %c0_16] : memref<512x128xbf16, #tpu.memory_space<vmem>>, vector<512x128xbf16>
      %cst_17 = arith.constant dense<0.000000e+00> : vector<2x128xf32>
      %20 = tpu.matmul %18, %19, %cst_17 {dimension_numbers = #tpu.dot_dimension_numbers<[1], [0], [0], [1], [0, 0, 1, 1], [], []>} : vector<2x512xbf16>, vector<512x128xbf16>, vector<2x128xf32> -> vector<2x128xf32>
      %c0_18 = arith.constant 0 : index
      %c0_19 = arith.constant 0 : index
      %c0_20 = arith.constant 0 : index
      %21 = vector.load %arg6[%c0_18, %c0_19, %c0_20] : memref<1x2x128xf32, #tpu.memory_space<vmem>>, vector<1x2x128xf32>
      %22 = vector.shape_cast %21 : vector<1x2x128xf32> to vector<2x128xf32>
      %23 = vector.shape_cast %20 : vector<2x128xf32> to vector<1x2x128xf32>
      tpu.vector_store %arg6[%c0_18, %c0_19, %c0_20], %23 {strides = array<i32>} : memref<1x2x128xf32, #tpu.memory_space<vmem>>, vector<1x2x128xf32>,
    } else {
    }
    return
  }
  func.func @transform_0(%arg0: i32, %arg1: i32) -> (i32, i32) {
    %c0_i32 = arith.constant 0 : i32
    %c0_i32_0 = arith.constant 0 : i32
    return %c0_i32, %arg1 : i32, i32
  }
  func.func @transform_1(%arg0: i32, %arg1: i32) -> (i32, i32) {
    %c0_i32 = arith.constant 0 : i32
    return %arg1, %arg0 : i32, i32
  }
  func.func @transform_2(%arg0: i32, %arg1: i32) -> (i32, i32) {
    %c0_i32 = arith.constant 0 : i32
    %c0_i32_0 = arith.constant 0 : i32
    return %c0_i32, %arg0 : i32, i32
  }
  func.func @transform_3(%arg0: i32, %arg1: i32) -> (i32, i32) {
    %c0_i32 = arith.constant 0 : i32
    %c0_i32_0 = arith.constant 0 : i32
    return %arg0, %c0_i32 : i32, i32
  }
  func.func @transform_4(%arg0: i32, %arg1: i32) -> (i32, i32, i32) {
    %c0_i32 = arith.constant 0 : i32
    %c0_i32_0 = arith.constant 0 : i32
    %c0_i32_1 = arith.constant 0 : i32
    return %arg0, %c0_i32, %c0_i32_0 : i32, i32, i32
  }
}

</mosaic_0001>

<bundles_post_ra>
// kernel: simple_layers_forward.1
= control target key start
LH: loop header
LB: loop body
LE: loop exit
PB: predicated region body
PF: predicated region fallthrough
CT: control target
= control target key end

     0   :  { %s5281_s0 = inlined_call_operand.vmem [shape: bf16[2,1024], index: 0, kind: input, shape index: {}]   ;;  %s5282_s1 = inlined_call_operand.hbm [shape: bf16[1024,1024], index: 1, kind: input, shape index: {}]   ;;  %s5283_s2 = inlined_call_operand.hbm [shape: f32[1,1024], index: 2, kind: input, shape index: {}]   ;;  %s5284_s3 = inlined_call_operand.hbm [shape: bf16[1024,128], index: 3, kind: input, shape index: {}]   ;;  %s5285_s4 = inlined_call_operand.vmem [shape: f32[2,2,128], index: 4, kind: output, shape index: {}]  }
   0x1   :  { %5288 = sst [smem:[#allocation12_spill]] %s5283_s2 }
   0x2   :  { %9 = vsyncpa [#allocation4], 0 }
   0x3   :  { %11 = vsyncpa [#allocation4 + $0x1], 0 }
   0x4   :  { %12 = vsyncpa [#allocation6], 0 }
   0x5   :  { %14 = vsyncpa [#allocation6 + $0x1], 0  ;;  %s4518_s15 = smov 0   ;;  %s4520_s16 = smov 0  }
   0x6   :  { %s4522_s17 = smov 0   ;;  %s4524_s18 = smov 0  }
   0x7   :  { %s4526_s19 = smov 0   ;;  %s4528_s20 = smov 0  }
   0x8 LB: > { %s5286_s21 = sadd.s32 4294967295, %s4486_s20   ;;  %s32_s22 = sadd.s32 1, %s4482_s19  ;;  %s4486_s20 = sphi %s4528_s20, %s20_s20   ;;  %s4482_s19 = sphi %s4526_s19, %s5302_s19   ;;  %s4478_s18 = sphi %s4524_s18, %s5301_s18   ;;  %s4474_s17 = sphi %s4522_s17, %s5300_s17   ;;  %s4470_s16 = sphi %s4520_s16, %s5299_s16   ;;  %s4466_s15 = sphi %s4518_s15, %s5298_s15  }
   0x9   : > { %p34_p0 = scmp.ge.s32.totalorder %s32_s22, 2  ;;  %s67_s23 = sadd.s32 1, %s4474_s17 }
   0xa   : > { %p74_p1 = scmp.ne.s32.totalorder %s4474_s17, %s4470_s16  ;;  %p75_p2 = scmp.eq.s32.totalorder %s4486_s20, 0 }
   0xb   : > { %s5304_s22 = smov (%p34_p0, %s32_s22), 0  ;;  %p80_p4 = scmp.ne.s32.totalorder %s4470_s16, %s4466_s15 }
   0xc   : > { %5289 = sst [smem:[#allocation10_spill]] %s5304_s22  ;;  %p76_p3 = por %p75_p2, %p74_p1 }
   0xd   : > { %s63_s24 = ssub.s32 %s4482_s19, %s5304_s22  ;;  %p81_p5 = scmp.eq.s32.totalorder %s5286_s21, 0 }
   0xe   : > { %p65_p6 = scmp.eq.s32.totalorder %s63_s24, 0  ;;  %p4280_p8 = scmp.lt.s32.totalorder %s4486_s20, 2 }
   0xf   : > { %p4559_p7 = por %p81_p5, %p80_p4  ;;  %s4568_s27 = sand.u32 1, %s4474_s17  }
  0x10   : > { %s4565_s26 = scalar_select %p65_p6, %s4474_s17, %s67_s23  }
  0x11   : > { %p4570_p9 = pnand %p4280_p8, %p76_p3  ;;  %s2807_s29 = sshll.u32 %s4568_s27, 11 }
  0x12   : > { %5291 = sst [smem:[#allocation11_spill]] %s4565_s26  ;;  %s215_s30 = sand.u32 1, %s4486_s20  }
  0x13   : > { %s2810_s5 = sshll.u32 %s4568_s27, 2  ;;  %s2811_s6 = sshll.u32 %s4482_s19, 2 }
  0x14   : > { %s5293_s2 = sld [smem:[#allocation12_spill]]  ;;  %s219_s11 = scalar_lea.vmem [#allocation5], %s2810_s5 }
  0x15   : > { %s227_s12 = sshll.u32 %s219_s11, 4  ;;  %s4581_s13 = scalar_lea.sflag [#allocation6], %s215_s30  ;;  %s228_s12 = int_to_ptr.vmem [resolvable:$true] %s227_s12 }
  0x16   : > { %s2812_s14 = sshll.u32 %s4568_s27, 8  ;;  %p2815_p10 = scmp.ge.s32.totalorder %s4486_s20, 1 }
  0x17   : > { %p254_p11 = scmp.lt.s32.totalorder %s4486_s20, 3  ;;  %s3974_s23 = sshll.u32 %s4482_s19, 4 }
  0x18   : > { %s194_s24 = scalar_lea.vmem [#allocation3], %s2807_s29  ;;  %s202_s30 = scalar_lea.hbm %s5282_s1, %s3974_s23 }
  0x19   : > { %p4589_p12 = pnand %p2815_p10, %p254_p11  ;;  %s205_s5 = sshll.u32 %s194_s24, 4  ;;  %s206_s5 = int_to_ptr.vmem [resolvable:$true] %s205_s5 }
  0x1a   : > { %s223_s9 = scalar_lea.hbm %s5293_s2, %s2811_s6  ;;  %s203_s8 = sshll.u32 %s202_s30, 4  ;;  %s204_s8 = int_to_ptr.hbm [resolvable:$true] %s203_s8 }
  0x1b   : > { %s225_s10 = sshll.u32 %s223_s9, 4  ;;  %s191_s9 = scalar_lea.sflag [#allocation4], %s4568_s27  ;;  %s226_s10 = int_to_ptr.hbm [resolvable:$true] %s225_s10 }
  0x1c   : > { %4276 = dma.hbm_to_vmem [thread:$0]  (!%p4570_p9), %s226_s10, 64, %s228_s12, %s4581_s13  }
  0x1d   : > { %s4488_s10 = smov 512   ;;  %s4489_s11 = smov 256  }
  0x1e   : > { %s4490_s12 = smov 16   ;;  %s3975_s21 = sshll.u32 %s4482_s19, 8 }
  0x1f   : > { %4273 = dma.hbm_to_vmem [thread:$0]  (!%p4570_p9), %s204_s8, 32768, %s206_s5, %s191_s9, %s4488_s10, %s4489_s11, %s4490_s12  }
  0x20   : > { %s238_s2 = scalar_lea.vmem [#allocation7], %s2812_s14  ;;  %s243_s26 = scalar_lea.hbm %s5284_s3, %s3975_s21 }
  0x21   : > { %s246_s22 = sshll.u32 %s238_s2, 4  ;;  %s244_s23 = sshll.u32 %s243_s26, 4  ;;  %s247_s22 = int_to_ptr.vmem [resolvable:$true] %s246_s22  ;;  %s245_s23 = int_to_ptr.hbm [resolvable:$true] %s244_s23 }
  0x22   : > { %s4491_s6 = smov 64   ;;  %s4492_s7 = smov 4  }
  0x23   : > { %4279 = dma.hbm_to_vmem [thread:$0]  (!%p4570_p9), %s245_s23, 4096, %s247_s22, %s4581_s13, %s4491_s6, %s4491_s6, %s4492_s7  }
  0x24   : > { %258 = sbr.rel (%p4589_p12) target bundleno = 602 (0x25a), region = 36  ;;  %s4610_s27 = sand.u32 (!%p4589_p12), 1, %s4470_s16  }
  0x25   : > { %s2816_s2 = sshll.u32 (!%p4589_p12), %s4610_s27, 11  ;;  %s261_s14 = scalar_lea.sflag (!%p4589_p12), [#allocation4], %s4610_s27 }
  0x26   : > { %s4614_s5 = scalar_lea.vmem (!%p4589_p12), [#allocation3], %s2816_s2 }
  0x29   : > { %4457 = dma.done.wait (%p4559_p7), %s261_s14, 32768  }
  0x2a   : > { %4459 = vsyncadd (%p4559_p7), %s261_s14, 4294934528  ;;  %s5295_s21 = sadd.s32 4294967295, %s4486_s20   ;;  %s2817_s26 = sshll.u32 %s4610_s27, 2 }
  0x2b   : > { %s270_s22 = sand.u32 1, %s5295_s21   ;;  %s4623_s13 = scalar_lea.vmem [#allocation5], %s2817_s26 }
  0x2c   : > { %s271_s28 = scalar_lea.sflag [#allocation6], %s270_s22 }
  0x2d   : > { %4461 = dma.done.wait (%p4559_p7), %s271_s28, 4160  }
  0x2e   : > { %4463 = vsyncadd (%p4559_p7), %s271_s28, 4294963136  ;;  %v2934_v0 = vld [vmem:[%s4614_s5 + $0xe0] sm:$0xf]  ;;  %v4006_v1 = vld [vmem:[%s4614_s5 + $0xec] sm:$0xf0]  ;;  %vm2320_vm0 = vcmask 1041408  }
  0x2f   : > { %v3062_v2 = vld [vmem:[%s4614_s5 + $0x1e0] sm:$0xf]  ;;  %v2935_v3 = vor.u32 %v4006_v1, %v2934_v0  ;;  %v4038_v4 = vld [vmem:[%s4614_s5 + $0x1ec] sm:$0xf0]  ;;  %s2818_s30 = sshll.u32 %s4610_s27, 8  ;;  %vm2322_vm1 = vcmask 1045508  }
  0x30   : > { %v3190_v5 = vld [vmem:[%s4614_s5 + $0x2e0] sm:$0xf]  ;;  %v4070_v6 = vld [vmem:[%s4614_s5 + $0x2ec] sm:$0xf0]  ;;  %v3063_v7 = vor.u32 %v4038_v4, %v3062_v2  ;;  %s5216_s8 = scalar_lea.vmem [#allocation7], %s2818_s30  ;;  %vm2324_vm2 = vcmask 1043456  }
  0x31   : > { %v3191_v8 = vor.u32 %v4070_v6, %v3190_v5  ;;  %v3318_v9 = vld [vmem:[%s4614_s5 + $0x3e0] sm:$0xf]  ;;  %v4102_v10 = vld [vmem:[%s4614_s5 + $0x3ec] sm:$0xf0]  ;;  %1897 = vmatpush.bf16.msra.mxu0 %v2935_v3  ;;  %p332_p13 = scmp.lt.s32.totalorder %s4478_s18, 1 }
  0x32   : > { %v2918_v11 = vld [vmem:[%s4614_s5 + $0xc0] sm:$0xf]  ;;  %v3319_v12 = vor.u32 %v4102_v10, %v3318_v9  ;;  %v4002_v13 = vld [vmem:[%s4614_s5 + $0xcc] sm:$0xf0]  ;;  %1910 = vmatpush.bf16.msra.mxu1 %v3063_v7 }
  0x33   : > { %v3046_v14 = vld [vmem:[%s4614_s5 + $0x1c0] sm:$0xf]  ;;  %v4034_v15 = vld [vmem:[%s4614_s5 + $0x1cc] sm:$0xf0]  ;;  %1923 = vmatpush.bf16.msra.mxu2 %v3191_v8  ;;  %v2919_v16 = vor.u32 %v4002_v13, %v2918_v11  ;;  %s5306_s18 = smov (!%p332_p13, %s4478_s18), 1 }
  0x34   : > { %v3047_v17 = vor.u32 %v4034_v15, %v3046_v14  ;;  %v3174_v18 = vld [vmem:[%s4614_s5 + $0x2c0] sm:$0xf]  ;;  %v4066_v19 = vld [vmem:[%s4614_s5 + $0x2cc] sm:$0xf0]  ;;  %1936 = vmatpush.bf16.msra.mxu3 %v3319_v12  ;;  %s2819_s9 = sshll.u32 %s5306_s18, 1 }
  0x35   : > { %v3302_v20 = vld [vmem:[%s4614_s5 + $0x3c0] sm:$0xf]  ;;  %v3175_v21 = vor.u32 %v4066_v19, %v3174_v18  ;;  %v4098_v22 = vld [vmem:[%s4614_s5 + $0x3cc] sm:$0xf0]  ;;  %1898 = vmatpush.bf16.msra.mxu0 %v2919_v16  ;;  %s335_s12 = scalar_lea.vmem %s5285_s4, %s2819_s9 }
  0x36   : > { %v2902_v23 = vld [vmem:[%s4614_s5 + $0xa0] sm:$0xf]  ;;  %v3998_v24 = vld [vmem:[%s4614_s5 + $0xac] sm:$0xf0]  ;;  %v3303_v25 = vor.u32 %v4098_v22, %v3302_v20  ;;  %1911 = vmatpush.bf16.msra.mxu1 %v3047_v17 }
  0x37   : > { %v3030_v26 = vld [vmem:[%s4614_s5 + $0x1a0] sm:$0xf]  ;;  %v4030_v27 = vld [vmem:[%s4614_s5 + $0x1ac] sm:$0xf0]  ;;  %v2903_v29 = vor.u32 %v3998_v24, %v2902_v23  ;;  %1924 = vmatpush.bf16.msra.mxu2 %v3175_v21 }
  0x38   : > { %v3158_v28 = vld [vmem:[%s4614_s5 + $0x2a0] sm:$0xf]  ;;  %v4062_v30 = vld [vmem:[%s4614_s5 + $0x2ac] sm:$0xf0]  ;;  %v3031_v33 = vor.u32 %v4030_v27, %v3030_v26  ;;  %1937 = vmatpush.bf16.msra.mxu3 %v3303_v25 }
  0x39   : > { %v3286_v31 = vld [vmem:[%s4614_s5 + $0x3a0] sm:$0xf]  ;;  %v4094_v32 = vld [vmem:[%s4614_s5 + $0x3ac] sm:$0xf0]  ;;  %v3159_v34 = vor.u32 %v4062_v30, %v3158_v28  ;;  %1899 = vmatpush.bf16.msra.mxu0 %v2903_v29 }
  0x3a   : > { %v2886_v35 = vld [vmem:[%s4614_s5 + $0x80] sm:$0xf]  ;;  %v3994_v36 = vld [vmem:[%s4614_s5 + $0x8c] sm:$0xf0]  ;;  %v3287_v38 = vor.u32 %v4094_v32, %v3286_v31  ;;  %1912 = vmatpush.bf16.msra.mxu1 %v3031_v33 }
  0x3b   : > { %v3014_v37 = vld [vmem:[%s4614_s5 + $0x180] sm:$0xf]  ;;  %v4026_v39 = vld [vmem:[%s4614_s5 + $0x18c] sm:$0xf0]  ;;  %v2887_v44 = vor.u32 %v3994_v36, %v2886_v35  ;;  %1925 = vmatpush.bf16.msra.mxu2 %v3159_v34 }
  0x3c   : > { %v3142_v40 = vld [vmem:[%s4614_s5 + $0x280] sm:$0xf]  ;;  %v4058_v41 = vld [vmem:[%s4614_s5 + $0x28c] sm:$0xf0]  ;;  %v3015_v45 = vor.u32 %v4026_v39, %v3014_v37  ;;  %1938 = vmatpush.bf16.msra.mxu3 %v3287_v38 }
  0x3d   : > { %v3270_v42 = vld [vmem:[%s4614_s5 + $0x380] sm:$0xf]  ;;  %v4090_v43 = vld [vmem:[%s4614_s5 + $0x38c] sm:$0xf0]  ;;  %v3143_v46 = vor.u32 %v4058_v41, %v3142_v40  ;;  %1900 = vmatpush.bf16.msra.mxu0 %v2887_v44 }
  0x3e   : > { %v2870_v47 = vld [vmem:[%s4614_s5 + $0x60] sm:$0xf]  ;;  %v3990_v48 = vld [vmem:[%s4614_s5 + $0x6c] sm:$0xf0]  ;;  %v3271_v50 = vor.u32 %v4090_v43, %v3270_v42  ;;  %1913 = vmatpush.bf16.msra.mxu1 %v3015_v45 }
  0x3f   : > { %v2998_v49 = vld [vmem:[%s4614_s5 + $0x160] sm:$0xf]  ;;  %v4022_v51 = vld [vmem:[%s4614_s5 + $0x16c] sm:$0xf0]  ;;  %v2871_v56 = vor.u32 %v3990_v48, %v2870_v47  ;;  %1926 = vmatpush.bf16.msra.mxu2 %v3143_v46 }
  0x40   : > { %v3126_v52 = vld [vmem:[%s4614_s5 + $0x260] sm:$0xf]  ;;  %v4054_v53 = vld [vmem:[%s4614_s5 + $0x26c] sm:$0xf0]  ;;  %v2999_v57 = vor.u32 %v4022_v51, %v2998_v49  ;;  %1939 = vmatpush.bf16.msra.mxu3 %v3271_v50 }
  0x41   : > { %v3254_v54 = vld [vmem:[%s4614_s5 + $0x360] sm:$0xf]  ;;  %v4086_v55 = vld [vmem:[%s4614_s5 + $0x36c] sm:$0xf0]  ;;  %v3127_v58 = vor.u32 %v4054_v53, %v3126_v52  ;;  %1901 = vmatpush.bf16.msra.mxu0 %v2871_v56 }
  0x42   : > { %v2854_v59 = vld [vmem:[%s4614_s5 + $0x40] sm:$0xf]  ;;  %v3986_v60 = vld [vmem:[%s4614_s5 + $0x4c] sm:$0xf0]  ;;  %v3255_v62 = vor.u32 %v4086_v55, %v3254_v54  ;;  %1914 = vmatpush.bf16.msra.mxu1 %v2999_v57 }
  0x43   : > { %v2982_v61 = vld [vmem:[%s4614_s5 + $0x140] sm:$0xf]  ;;  %v4018_v63 = vld [vmem:[%s4614_s5 + $0x14c] sm:$0xf0]  ;;  %v2855_v4 = vor.u32 %v3986_v60, %v2854_v59  ;;  %1927 = vmatpush.bf16.msra.mxu2 %v3127_v58  ;;  %v342_v59 = vld [vmem:[%s5281_s0] sm:$0xff] }
  0x44   : > { %v3110_v0 = vld [vmem:[%s4614_s5 + $0x240] sm:$0xf]  ;;  %v4050_v1 = vld [vmem:[%s4614_s5 + $0x24c] sm:$0xf0]  ;;  %v2983_v5 = vor.u32 %v4018_v63, %v2982_v61  ;;  %1940 = vmatpush.bf16.msra.mxu3 %v3255_v62  ;;  %600 = vst [vmem:[#allocation1] ss:$9 sm:$0xff] %v342_v59 }
  0x45   : > { %v3238_v2 = vld [vmem:[%s4614_s5 + $0x340] sm:$0xf]  ;;  %v4082_v3 = vld [vmem:[%s4614_s5 + $0x34c] sm:$0xf0]  ;;  %v3111_v6 = vor.u32 %v4050_v1, %v3110_v0  ;;  %1902 = vmatpush.bf16.msra.mxu0 %v2855_v4 }
  0x46   : > { %v2838_v7 = vld [vmem:[%s4614_s5 + $0x20] sm:$0xf]  ;;  %v3982_v8 = vld [vmem:[%s4614_s5 + $0x2c] sm:$0xf0]  ;;  %v3239_v10 = vor.u32 %v4082_v3, %v3238_v2  ;;  %1915 = vmatpush.bf16.msra.mxu1 %v2983_v5 }
  0x47   : > { %v2966_v9 = vld [vmem:[%s4614_s5 + $0x120] sm:$0xf]  ;;  %v4014_v11 = vld [vmem:[%s4614_s5 + $0x12c] sm:$0xf0]  ;;  %v2839_v16 = vor.u32 %v3982_v8, %v2838_v7  ;;  %1928 = vmatpush.bf16.msra.mxu2 %v3111_v6 }
  0x48   : > { %v3094_v12 = vld [vmem:[%s4614_s5 + $0x220] sm:$0xf]  ;;  %v4046_v13 = vld [vmem:[%s4614_s5 + $0x22c] sm:$0xf0]  ;;  %v2967_v19 = vor.u32 %v4014_v11, %v2966_v9  ;;  %1941 = vmatpush.bf16.msra.mxu3 %v3239_v10 }
  0x49   : > { %v3222_v14 = vld [vmem:[%s4614_s5 + $0x320] sm:$0xf]  ;;  %v4078_v15 = vld [vmem:[%s4614_s5 + $0x32c] sm:$0xf0]  ;;  %v3095_v20 = vor.u32 %v4046_v13, %v3094_v12  ;;  %1903 = vmatpush.bf16.msra.mxu0 %v2839_v16 }
  0x4a   : > { %v2822_v17 = vld [vmem:[%s4614_s5] sm:$0xf]  ;;  %v3978_v18 = vld [vmem:[%s4614_s5 + $0xc] sm:$0xf0]  ;;  %v3223_v24 = vor.u32 %v4078_v15, %v3222_v14  ;;  %1916 = vmatpush.bf16.msra.mxu1 %v2967_v19 }
  0x4b   : > { %v2950_v21 = vld [vmem:[%s4614_s5 + $0x100] sm:$0xf]  ;;  %v4010_v22 = vld [vmem:[%s4614_s5 + $0x10c] sm:$0xf0]  ;;  %v2823_v31 = vor.u32 %v3978_v18, %v2822_v17  ;;  %1929 = vmatpush.bf16.msra.mxu2 %v3095_v20 }
  0x4c   : > { %v3078_v23 = vld [vmem:[%s4614_s5 + $0x200] sm:$0xf]  ;;  %v4042_v25 = vld [vmem:[%s4614_s5 + $0x20c] sm:$0xf0]  ;;  %v2951_v35 = vor.u32 %v4010_v22, %v2950_v21  ;;  %1942 = vmatpush.bf16.msra.mxu3 %v3223_v24  ;;  %v4734_v21 = vld [vmem:[#allocation1] sm:$0xff] }
  0x4d   : > { %v3206_v26 = vld [vmem:[%s4614_s5 + $0x300] sm:$0xf]  ;;  %v4074_v27 = vld [vmem:[%s4614_s5 + $0x30c] sm:$0xf0]  ;;  %v3079_v36 = vor.u32 %v4042_v25, %v3078_v23  ;;  %1904 = vmatpush.bf16.msra.mxu0 %v2823_v31 }
  0x4e   : > { %v3446_v28 = vld [vmem:[%s4614_s5 + $0x4e0] sm:$0xf]  ;;  %v4134_v29 = vld [vmem:[%s4614_s5 + $0x4ec] sm:$0xf0]  ;;  %v3207_v39 = vor.u32 %v4074_v27, %v3206_v26  ;;  %1917 = vmatpush.bf16.msra.mxu1 %v2951_v35 }
  0x4f   : > { %v3574_v30 = vld [vmem:[%s4614_s5 + $0x5e0] sm:$0xf]  ;;  %v4166_v32 = vld [vmem:[%s4614_s5 + $0x5ec] sm:$0xf0]  ;;  %v3447_v40 = vor.u32 %v4134_v29, %v3446_v28  ;;  %1930 = vmatpush.bf16.msra.mxu2 %v3079_v36 }
  0x50   : > { %v3702_v33 = vld [vmem:[%s4614_s5 + $0x6e0] sm:$0xf]  ;;  %v4198_v34 = vld [vmem:[%s4614_s5 + $0x6ec] sm:$0xf0]  ;;  %v3575_v41 = vor.u32 %v4166_v32, %v3574_v30  ;;  %1943 = vmatpush.bf16.msra.mxu3 %v3207_v39  ;;  %1905 = vmatmul.bf16.vlgmr.msra.gmra.mxu0 %v4734_v21 }
  0x51   : > { %v3830_v37 = vld [vmem:[%s4614_s5 + $0x7e0] sm:$0xf]  ;;  %v4230_v38 = vld [vmem:[%s4614_s5 + $0x7ec] sm:$0xf0]  ;;  %v3703_v42 = vor.u32 %v4198_v34, %v3702_v33  ;;  %1949 = vmatpush.bf16.msrb.mxu0 %v3447_v40 }
  0x52   : > { %v3430_v43 = vld [vmem:[%s4614_s5 + $0x4c0] sm:$0xf]  ;;  %v4130_v44 = vld [vmem:[%s4614_s5 + $0x4cc] sm:$0xf0]  ;;  %v3831_v46 = vor.u32 %v4230_v38, %v3830_v37  ;;  %1962 = vmatpush.bf16.msrb.mxu1 %v3575_v41 }
  0x53   : > { %v3558_v45 = vld [vmem:[%s4614_s5 + $0x5c0] sm:$0xf]  ;;  %v4162_v47 = vld [vmem:[%s4614_s5 + $0x5cc] sm:$0xf0]  ;;  %v3431_v52 = vor.u32 %v4130_v44, %v3430_v43  ;;  %1975 = vmatpush.bf16.msrb.mxu2 %v3703_v42 }
  0x54   : > { %v3686_v48 = vld [vmem:[%s4614_s5 + $0x6c0] sm:$0xf]  ;;  %v4194_v49 = vld [vmem:[%s4614_s5 + $0x6cc] sm:$0xf0]  ;;  %v3559_v55 = vor.u32 %v4162_v47, %v3558_v45  ;;  %1988 = vmatpush.bf16.msrb.mxu3 %v3831_v46 }
  0x55   : > { %v3814_v50 = vld [vmem:[%s4614_s5 + $0x7c0] sm:$0xf]  ;;  %v4226_v51 = vld [vmem:[%s4614_s5 + $0x7cc] sm:$0xf0]  ;;  %v3687_v56 = vor.u32 %v4194_v49, %v3686_v48  ;;  %1950 = vmatpush.bf16.msrb.mxu0 %v3431_v52 }
  0x56   : > { %v3414_v53 = vld [vmem:[%s4614_s5 + $0x4a0] sm:$0xf]  ;;  %v4126_v54 = vld [vmem:[%s4614_s5 + $0x4ac] sm:$0xf0]  ;;  %v3815_v60 = vor.u32 %v4226_v51, %v3814_v50  ;;  %1963 = vmatpush.bf16.msrb.mxu1 %v3559_v55 }
  0x57   : > { %v3542_v57 = vld [vmem:[%s4614_s5 + $0x5a0] sm:$0xf]  ;;  %v4158_v58 = vld [vmem:[%s4614_s5 + $0x5ac] sm:$0xf0]  ;;  %v3415_v1 = vor.u32 %v4126_v54, %v3414_v53  ;;  %1976 = vmatpush.bf16.msrb.mxu2 %v3687_v56 }
  0x58   : > { %v3670_v61 = vld [vmem:[%s4614_s5 + $0x6a0] sm:$0xf]  ;;  %v4190_v62 = vld [vmem:[%s4614_s5 + $0x6ac] sm:$0xf0]  ;;  %v3543_v2 = vor.u32 %v4158_v58, %v3542_v57  ;;  %1989 = vmatpush.bf16.msrb.mxu3 %v3815_v60 }
  0x59   : > { %v3798_v63 = vld [vmem:[%s4614_s5 + $0x7a0] sm:$0xf]  ;;  %v4222_v0 = vld [vmem:[%s4614_s5 + $0x7ac] sm:$0xf0]  ;;  %v3671_v3 = vor.u32 %v4190_v62, %v3670_v61  ;;  %1951 = vmatpush.bf16.msrb.mxu0 %v3415_v1  ;;  %v4004_v1 = vld [vmem:[%s4614_s5 + $0xe4] sm:$0xf] }
  0x5a   : > { %v3398_v4 = vld [vmem:[%s4614_s5 + $0x480] sm:$0xf]  ;;  %v4122_v5 = vld [vmem:[%s4614_s5 + $0x48c] sm:$0xf0]  ;;  %v3799_v7 = vor.u32 %v4222_v0, %v3798_v63  ;;  %1964 = vmatpush.bf16.msrb.mxu1 %v3543_v2  ;;  %v2936_v2 = vld [vmem:[%s4614_s5 + $0xf0] sm:$0xf0] }
  0x5b   : > { %v3526_v6 = vld [vmem:[%s4614_s5 + $0x580] sm:$0xf]  ;;  %v4154_v8 = vld [vmem:[%s4614_s5 + $0x58c] sm:$0xf0]  ;;  %v3399_v14 = vor.u32 %v4122_v5, %v3398_v4  ;;  %1977 = vmatpush.bf16.msrb.mxu2 %v3671_v3  ;;  %v4036_v3 = vld [vmem:[%s4614_s5 + $0x1e4] sm:$0xf] }
  0x5c   : > { %v3654_v9 = vld [vmem:[%s4614_s5 + $0x680] sm:$0xf]  ;;  %v4186_v10 = vld [vmem:[%s4614_s5 + $0x68c] sm:$0xf0]  ;;  %v3527_v18 = vor.u32 %v4154_v8, %v3526_v6  ;;  %1990 = vmatpush.bf16.msrb.mxu3 %v3799_v7  ;;  %v3064_v5 = vld [vmem:[%s4614_s5 + $0x1f0] sm:$0xf0] }
  0x5d   : > { %v3782_v11 = vld [vmem:[%s4614_s5 + $0x780] sm:$0xf]  ;;  %v4218_v12 = vld [vmem:[%s4614_s5 + $0x78c] sm:$0xf0]  ;;  %v3655_v19 = vor.u32 %v4186_v10, %v3654_v9  ;;  %1952 = vmatpush.bf16.msrb.mxu0 %v3399_v14  ;;  %v4068_v6 = vld [vmem:[%s4614_s5 + $0x2e4] sm:$0xf]  ;;  %v3067_v14 = vor.u32 %v4036_v3, %v3064_v5 }
  0x5e   : > { %v3382_v13 = vld [vmem:[%s4614_s5 + $0x460] sm:$0xf]  ;;  %v4118_v15 = vld [vmem:[%s4614_s5 + $0x46c] sm:$0xf0]  ;;  %v3783_v23 = vor.u32 %v4218_v12, %v3782_v11  ;;  %1965 = vmatpush.bf16.msrb.mxu1 %v3527_v18  ;;  %v3192_v7 = vld [vmem:[%s4614_s5 + $0x2f0] sm:$0xf0] }
  0x5f   : > { %v3510_v16 = vld [vmem:[%s4614_s5 + $0x560] sm:$0xf]  ;;  %v4150_v17 = vld [vmem:[%s4614_s5 + $0x56c] sm:$0xf0]  ;;  %v3383_v29 = vor.u32 %v4118_v15, %v3382_v13  ;;  %1978 = vmatpush.bf16.msrb.mxu2 %v3655_v19  ;;  %v4100_v10 = vld [vmem:[%s4614_s5 + $0x3e4] sm:$0xf]  ;;  %v2939_v13 = vor.u32 %v4004_v1, %v2936_v2  ;;  %v3195_v15 = vor.u32 %v4068_v6, %v3192_v7 }
  0x60   : > { %v4732_v20 = vld [vmem:[#allocation1 + $0x12] sm:$0xff]  ;;  %v4736_v22 = vld [vmem:[#allocation1 + $0x1b] sm:$0xff]  ;;  %v3638_v24 = vld [vmem:[%s4614_s5 + $0x660] sm:$0xf]  ;;  %v3511_v30 = vor.u32 %v4150_v17, %v3510_v16  ;;  %1991 = vmatpush.bf16.msrb.mxu3 %v3783_v23 }
  0x61   : > { %v4182_v25 = vld [vmem:[%s4614_s5 + $0x66c] sm:$0xf0]  ;;  %1931 = vmatmul.bf16.vlgmr.msra.gmra.mxu2 %v4732_v20  ;;  %v4741_v26 = vld [vmem:[#allocation1 + $0x9] sm:$0xff]  ;;  %1944 = vmatmul.bf16.vlgmr.msra.gmra.mxu3 %v4736_v22  ;;  %v3320_v11 = vld [vmem:[%s4614_s5 + $0x3f0] sm:$0xf0] }
  0x62   : > { %v3766_v27 = vld [vmem:[%s4614_s5 + $0x760] sm:$0xf]  ;;  %v4214_v28 = vld [vmem:[%s4614_s5 + $0x76c] sm:$0xf0]  ;;  %1918 = vmatmul.bf16.vlgmr.msra.gmra.mxu1 %v4741_v26  ;;  %v3639_v31 = vor.u32 %v4182_v25, %v3638_v24  ;;  %1953 = vmatpush.bf16.msrb.mxu0 %v3383_v29  ;;  %v4000_v16 = vld [vmem:[%s4614_s5 + $0xc4] sm:$0xf]  ;;  %v3323_v19 = vor.u32 %v4100_v10, %v3320_v11 }
  0x63   : > { %v3366_v32 = vld [vmem:[%s4614_s5 + $0x440] sm:$0xf]  ;;  %v4114_v33 = vld [vmem:[%s4614_s5 + $0x44c] sm:$0xf0]  ;;  %v3767_v35 = vor.u32 %v4214_v28, %v3766_v27  ;;  %1966 = vmatpush.bf16.msrb.mxu1 %v3511_v30  ;;  %v2920_v17 = vld [vmem:[%s4614_s5 + $0xd0] sm:$0xf0] }
  0x64   : > { %v3494_v34 = vld [vmem:[%s4614_s5 + $0x540] sm:$0xf]  ;;  %v4146_v36 = vld [vmem:[%s4614_s5 + $0x54c] sm:$0xf0]  ;;  %v3367_v41 = vor.u32 %v4114_v33, %v3366_v32  ;;  %1979 = vmatpush.bf16.msrb.mxu2 %v3639_v31  ;;  %v4032_v18 = vld [vmem:[%s4614_s5 + $0x1c4] sm:$0xf]  ;;  %v2923_v30 = vor.u32 %v4000_v16, %v2920_v17 }
  0x65   : > { %v3622_v37 = vld [vmem:[%s4614_s5 + $0x640] sm:$0xf]  ;;  %v4178_v38 = vld [vmem:[%s4614_s5 + $0x64c] sm:$0xf0]  ;;  %v3495_v42 = vor.u32 %v4146_v36, %v3494_v34  ;;  %1992 = vmatpush.bf16.msrb.mxu3 %v3767_v35  ;;  %v3048_v23 = vld [vmem:[%s4614_s5 + $0x1d0] sm:$0xf0] }
  0x66   : > { %v3750_v39 = vld [vmem:[%s4614_s5 + $0x740] sm:$0xf]  ;;  %v4210_v40 = vld [vmem:[%s4614_s5 + $0x74c] sm:$0xf0]  ;;  %v3623_v43 = vor.u32 %v4178_v38, %v3622_v37  ;;  %1954 = vmatpush.bf16.msrb.mxu0 %v3367_v41  ;;  %v4064_v24 = vld [vmem:[%s4614_s5 + $0x2c4] sm:$0xf]  ;;  %v3051_v34 = vor.u32 %v4032_v18, %v3048_v23 }
  0x67   : > { %v3350_v44 = vld [vmem:[%s4614_s5 + $0x420] sm:$0xf]  ;;  %v4110_v45 = vld [vmem:[%s4614_s5 + $0x42c] sm:$0xf0]  ;;  %v3751_v47 = vor.u32 %v4210_v40, %v3750_v39  ;;  %1967 = vmatpush.bf16.msrb.mxu1 %v3495_v42  ;;  %v3176_v25 = vld [vmem:[%s4614_s5 + $0x2d0] sm:$0xf0] }
  0x68   : > { %v3478_v46 = vld [vmem:[%s4614_s5 + $0x520] sm:$0xf]  ;;  %v4142_v48 = vld [vmem:[%s4614_s5 + $0x52c] sm:$0xf0]  ;;  %v3351_v53 = vor.u32 %v4110_v45, %v3350_v44  ;;  %1980 = vmatpush.bf16.msrb.mxu2 %v3623_v43  ;;  %v4096_v27 = vld [vmem:[%s4614_s5 + $0x3c4] sm:$0xf]  ;;  %v3179_v35 = vor.u32 %v4064_v24, %v3176_v25 }
  0x69   : > { %v3606_v49 = vld [vmem:[%s4614_s5 + $0x620] sm:$0xf]  ;;  %v4174_v50 = vld [vmem:[%s4614_s5 + $0x62c] sm:$0xf0]  ;;  %v3479_v56 = vor.u32 %v4142_v48, %v3478_v46  ;;  %1993 = vmatpush.bf16.msrb.mxu3 %v3751_v47  ;;  %v3304_v28 = vld [vmem:[%s4614_s5 + $0x3d0] sm:$0xf0] }
  0x6a   : > { %v3734_v51 = vld [vmem:[%s4614_s5 + $0x720] sm:$0xf]  ;;  %v4206_v52 = vld [vmem:[%s4614_s5 + $0x72c] sm:$0xf0]  ;;  %v3607_v57 = vor.u32 %v4174_v50, %v3606_v49  ;;  %1955 = vmatpush.bf16.msrb.mxu0 %v3351_v53  ;;  %v4792_v32 = vld [vmem:[#allocation1 + $0x3f] sm:$0xff]  ;;  %v3307_v39 = vor.u32 %v4096_v27, %v3304_v28 }
  0x6b   : > { %v3334_v54 = vld [vmem:[%s4614_s5 + $0x400] sm:$0xf]  ;;  %v4106_v55 = vld [vmem:[%s4614_s5 + $0x40c] sm:$0xf0]  ;;  %v3735_v61 = vor.u32 %v4206_v52, %v3734_v51  ;;  %1968 = vmatpush.bf16.msrb.mxu1 %v3479_v56  ;;  %v3996_v33 = vld [vmem:[%s4614_s5 + $0xa4] sm:$0xf] }
  0x6c   : > { %v3462_v58 = vld [vmem:[%s4614_s5 + $0x500] sm:$0xf]  ;;  %v4138_v59 = vld [vmem:[%s4614_s5 + $0x50c] sm:$0xf0]  ;;  %v3335_v4 = vor.u32 %v4106_v55, %v3334_v54  ;;  %1981 = vmatpush.bf16.msrb.mxu2 %v3607_v57  ;;  %v2904_v36 = vld [vmem:[%s4614_s5 + $0xb0] sm:$0xf0] }
  0x6d   : > { %v3590_v60 = vld [vmem:[%s4614_s5 + $0x600] sm:$0xf]  ;;  %v4170_v62 = vld [vmem:[%s4614_s5 + $0x60c] sm:$0xf0]  ;;  %v3463_v8 = vor.u32 %v4138_v59, %v3462_v58  ;;  %1994 = vmatpush.bf16.msrb.mxu3 %v3735_v61  ;;  %v4028_v37 = vld [vmem:[%s4614_s5 + $0x1a4] sm:$0xf]  ;;  %v2907_v45 = vor.u32 %v3996_v33, %v2904_v36 }
  0x6e   : > { %v3718_v63 = vld [vmem:[%s4614_s5 + $0x700] sm:$0xf]  ;;  %v4202_v0 = vld [vmem:[%s4614_s5 + $0x70c] sm:$0xf0]  ;;  %v3591_v9 = vor.u32 %v4170_v62, %v3590_v60  ;;  %1956 = vmatpush.bf16.msrb.mxu0 %v3335_v4  ;;  %v4797_v38 = vld [vmem:[#allocation1 + $0x2d] sm:$0xff] }
  0x6f   : > { %v3719_v12 = vor.u32 %v4202_v0, %v3718_v63  ;;  %1969 = vmatpush.bf16.msrb.mxu1 %v3463_v8  ;;  %v4788_v29 = vld [vmem:[#allocation1 + $0x36] sm:$0xff]  ;;  %v4790_v31 = vld [vmem:[#allocation1 + $0x24] sm:$0xff]  ;;  %v4060_v41 = vld [vmem:[%s4614_s5 + $0x2a4] sm:$0xf] }
  0x70   : > { %1982 = vmatpush.bf16.msrb.mxu2 %v3591_v9  ;;  %v3032_v40 = vld [vmem:[%s4614_s5 + $0x1b0] sm:$0xf0]  ;;  %v4092_v43 = vld [vmem:[%s4614_s5 + $0x3a4] sm:$0xf] }
  0x71   : > { %1995 = vmatpush.bf16.msrb.mxu3 %v3719_v12  ;;  %v3160_v42 = vld [vmem:[%s4614_s5 + $0x2b0] sm:$0xf0]  ;;  %1957 = vmatmul.bf16.vlgmr.msrb.gmra.mxu0 %v4790_v31  ;;  %v3035_v46 = vor.u32 %v4028_v37, %v3032_v40  ;;  %v3992_v48 = vld [vmem:[%s4614_s5 + $0x84] sm:$0xf] }
  0x72   : > { %2001 = vmatpush.bf16.msra.mxu0 %v2939_v13  ;;  %v3288_v44 = vld [vmem:[%s4614_s5 + $0x3b0] sm:$0xf0]  ;;  %1970 = vmatmul.bf16.vlgmr.msrb.gmra.mxu1 %v4797_v38  ;;  %v3163_v47 = vor.u32 %v4060_v41, %v3160_v42  ;;  %v4024_v50 = vld [vmem:[%s4614_s5 + $0x184] sm:$0xf] }
  0x73   : > { %2014 = vmatpush.bf16.msra.mxu1 %v3067_v14  ;;  %1983 = vmatmul.bf16.vlgmr.msrb.gmra.mxu2 %v4788_v29  ;;  %v2888_v49 = vld [vmem:[%s4614_s5 + $0x90] sm:$0xf0]  ;;  %v3291_v51 = vor.u32 %v4092_v43, %v3288_v44  ;;  %v4056_v53 = vld [vmem:[%s4614_s5 + $0x284] sm:$0xf] }
  0x74   : > { %2027 = vmatpush.bf16.msra.mxu2 %v3195_v15  ;;  %1996 = vmatmul.bf16.vlgmr.msrb.gmra.mxu3 %v4792_v32  ;;  %v3016_v52 = vld [vmem:[%s4614_s5 + $0x190] sm:$0xf0]  ;;  %v4088_v55 = vld [vmem:[%s4614_s5 + $0x384] sm:$0xf]  ;;  %v2891_v57 = vor.u32 %v3992_v48, %v2888_v49 }
  0x75   : > { %2040 = vmatpush.bf16.msra.mxu3 %v3323_v19  ;;  %v3144_v54 = vld [vmem:[%s4614_s5 + $0x290] sm:$0xf0]  ;;  %v3019_v58 = vor.u32 %v4024_v50, %v3016_v52  ;;  %v3988_v60 = vld [vmem:[%s4614_s5 + $0x64] sm:$0xf] }
  0x76   : > { %2002 = vmatpush.bf16.msra.mxu0 %v2923_v30  ;;  %v3272_v56 = vld [vmem:[%s4614_s5 + $0x390] sm:$0xf0]  ;;  %v3147_v59 = vor.u32 %v4056_v53, %v3144_v54  ;;  %v4020_v62 = vld [vmem:[%s4614_s5 + $0x164] sm:$0xf] }
  0x77   : > { %2015 = vmatpush.bf16.msra.mxu1 %v3051_v34  ;;  %v2872_v61 = vld [vmem:[%s4614_s5 + $0x70] sm:$0xf0]  ;;  %v3275_v63 = vor.u32 %v4088_v55, %v3272_v56  ;;  %v4052_v1 = vld [vmem:[%s4614_s5 + $0x264] sm:$0xf] }
  0x78   : > { %2028 = vmatpush.bf16.msra.mxu2 %v3179_v35  ;;  %v3000_v0 = vld [vmem:[%s4614_s5 + $0x170] sm:$0xf0]  ;;  %v4084_v3 = vld [vmem:[%s4614_s5 + $0x364] sm:$0xf]  ;;  %v2875_v5 = vor.u32 %v3988_v60, %v2872_v61 }
  0x79   : > { %2041 = vmatpush.bf16.msra.mxu3 %v3307_v39  ;;  %v3128_v2 = vld [vmem:[%s4614_s5 + $0x270] sm:$0xf0]  ;;  %v3003_v6 = vor.u32 %v4020_v62, %v3000_v0  ;;  %v3984_v8 = vld [vmem:[%s4614_s5 + $0x44] sm:$0xf] }
  0x7a   : > { %2003 = vmatpush.bf16.msra.mxu0 %v2907_v45  ;;  %v3256_v4 = vld [vmem:[%s4614_s5 + $0x370] sm:$0xf0]  ;;  %v3131_v7 = vor.u32 %v4052_v1, %v3128_v2  ;;  %v4016_v10 = vld [vmem:[%s4614_s5 + $0x144] sm:$0xf] }
  0x7b   : > { %2016 = vmatpush.bf16.msra.mxu1 %v3035_v46  ;;  %v2856_v9 = vld [vmem:[%s4614_s5 + $0x50] sm:$0xf0]  ;;  %v3259_v11 = vor.u32 %v4084_v3, %v3256_v4  ;;  %v4048_v13 = vld [vmem:[%s4614_s5 + $0x244] sm:$0xf] }
  0x7c   : > { %2029 = vmatpush.bf16.msra.mxu2 %v3163_v47  ;;  %v2984_v12 = vld [vmem:[%s4614_s5 + $0x150] sm:$0xf0]  ;;  %v4080_v15 = vld [vmem:[%s4614_s5 + $0x344] sm:$0xf]  ;;  %v2859_v17 = vor.u32 %v3984_v8, %v2856_v9 }
  0x7d   : > { %2042 = vmatpush.bf16.msra.mxu3 %v3291_v51  ;;  %v3112_v14 = vld [vmem:[%s4614_s5 + $0x250] sm:$0xf0]  ;;  %v2987_v18 = vor.u32 %v4016_v10, %v2984_v12  ;;  %v3980_v23 = vld [vmem:[%s4614_s5 + $0x24] sm:$0xf] }
  0x7e   : > { %2004 = vmatpush.bf16.msra.mxu0 %v2891_v57  ;;  %v3240_v16 = vld [vmem:[%s4614_s5 + $0x350] sm:$0xf0]  ;;  %v3115_v19 = vor.u32 %v4048_v13, %v3112_v14  ;;  %v4012_v25 = vld [vmem:[%s4614_s5 + $0x124] sm:$0xf] }
  0x7f   : > { %2017 = vmatpush.bf16.msra.mxu1 %v3019_v58  ;;  %v2840_v24 = vld [vmem:[%s4614_s5 + $0x30] sm:$0xf0]  ;;  %v3243_v27 = vor.u32 %v4080_v15, %v3240_v16  ;;  %v4044_v30 = vld [vmem:[%s4614_s5 + $0x224] sm:$0xf] }
  0x80   : > { %2030 = vmatpush.bf16.msra.mxu2 %v3147_v59  ;;  %v2968_v28 = vld [vmem:[%s4614_s5 + $0x130] sm:$0xf0]  ;;  %v4076_v34 = vld [vmem:[%s4614_s5 + $0x324] sm:$0xf]  ;;  %v2843_v36 = vor.u32 %v3980_v23, %v2840_v24 }
  0x81   : > { %2043 = vmatpush.bf16.msra.mxu3 %v3275_v63  ;;  %v3096_v33 = vld [vmem:[%s4614_s5 + $0x230] sm:$0xf0]  ;;  %v3976_v37 = vld [vmem:[%s4614_s5 + $0x4] sm:$0xf]  ;;  %v2971_v40 = vor.u32 %v4012_v25, %v2968_v28 }
  0x82   : > { %2005 = vmatpush.bf16.msra.mxu0 %v2875_v5  ;;  %v3224_v35 = vld [vmem:[%s4614_s5 + $0x330] sm:$0xf0]  ;;  %v3099_v41 = vor.u32 %v4044_v30, %v3096_v33  ;;  %v4008_v42 = vld [vmem:[%s4614_s5 + $0x104] sm:$0xf] }
  0x83   : > { %2018 = vmatpush.bf16.msra.mxu1 %v3003_v6  ;;  %v2824_v39 = vld [vmem:[%s4614_s5 + $0x10] sm:$0xf0]  ;;  %v4040_v44 = vld [vmem:[%s4614_s5 + $0x204] sm:$0xf]  ;;  %v3227_v45 = vor.u32 %v4076_v34, %v3224_v35 }
  0x84   : > { %2031 = vmatpush.bf16.msra.mxu2 %v3131_v7  ;;  %v2952_v43 = vld [vmem:[%s4614_s5 + $0x110] sm:$0xf0]  ;;  %v4072_v47 = vld [vmem:[%s4614_s5 + $0x304] sm:$0xf]  ;;  %v2827_v52 = vor.u32 %v3976_v37, %v2824_v39 }
  0x85   : > { %2044 = vmatpush.bf16.msra.mxu3 %v3259_v11  ;;  %v3080_v46 = vld [vmem:[%s4614_s5 + $0x210] sm:$0xf0]  ;;  %v4132_v49 = vld [vmem:[%s4614_s5 + $0x4e4] sm:$0xf]  ;;  %v2955_v56 = vor.u32 %v4008_v42, %v2952_v43 }
  0x86   : > { %2006 = vmatpush.bf16.msra.mxu0 %v2859_v17  ;;  %v3208_v48 = vld [vmem:[%s4614_s5 + $0x310] sm:$0xf0]  ;;  %v4164_v51 = vld [vmem:[%s4614_s5 + $0x5e4] sm:$0xf]  ;;  %v3083_v57 = vor.u32 %v4040_v44, %v3080_v46 }
  0x87   : > { %2019 = vmatpush.bf16.msra.mxu1 %v2987_v18  ;;  %v3448_v50 = vld [vmem:[%s4614_s5 + $0x4f0] sm:$0xf0]  ;;  %v4196_v54 = vld [vmem:[%s4614_s5 + $0x6e4] sm:$0xf]  ;;  %v3211_v60 = vor.u32 %v4072_v47, %v3208_v48 }
  0x88   : > { %2032 = vmatpush.bf16.msra.mxu2 %v3115_v19  ;;  %v3576_v53 = vld [vmem:[%s4614_s5 + $0x5f0] sm:$0xf0]  ;;  %v4228_v58 = vld [vmem:[%s4614_s5 + $0x7e4] sm:$0xf]  ;;  %v3451_v61 = vor.u32 %v4132_v49, %v3448_v50 }
  0x89   : > { %2045 = vmatpush.bf16.msra.mxu3 %v3243_v27  ;;  %v3704_v55 = vld [vmem:[%s4614_s5 + $0x6f0] sm:$0xf0]  ;;  %v3579_v62 = vor.u32 %v4164_v51, %v3576_v53  ;;  %v4128_v0 = vld [vmem:[%s4614_s5 + $0x4c4] sm:$0xf] }
  0x8a   : > { %2007 = vmatpush.bf16.msra.mxu0 %v2843_v36  ;;  %v3832_v59 = vld [vmem:[%s4614_s5 + $0x7f0] sm:$0xf0]  ;;  %v3707_v63 = vor.u32 %v4196_v54, %v3704_v55  ;;  %v4160_v2 = vld [vmem:[%s4614_s5 + $0x5c4] sm:$0xf] }
  0x8b   : > { %2020 = vmatpush.bf16.msra.mxu1 %v2971_v40  ;;  %v3432_v1 = vld [vmem:[%s4614_s5 + $0x4d0] sm:$0xf0]  ;;  %v3835_v3 = vor.u32 %v4228_v58, %v3832_v59  ;;  %v4192_v5 = vld [vmem:[%s4614_s5 + $0x6c4] sm:$0xf] }
  0x8c   : > { %2033 = vmatpush.bf16.msra.mxu2 %v3099_v41  ;;  %v3560_v4 = vld [vmem:[%s4614_s5 + $0x5d0] sm:$0xf0]  ;;  %v4224_v7 = vld [vmem:[%s4614_s5 + $0x7c4] sm:$0xf]  ;;  %v3435_v9 = vor.u32 %v4128_v0, %v3432_v1 }
  0x8d   : > { %2046 = vmatpush.bf16.msra.mxu3 %v3227_v45  ;;  %v3688_v6 = vld [vmem:[%s4614_s5 + $0x6d0] sm:$0xf0]  ;;  %v3563_v10 = vor.u32 %v4160_v2, %v3560_v4  ;;  %v4124_v12 = vld [vmem:[%s4614_s5 + $0x4a4] sm:$0xf] }
  0x8e   : > { %2008 = vmatpush.bf16.msra.mxu0 %v2827_v52  ;;  %v3816_v8 = vld [vmem:[%s4614_s5 + $0x7d0] sm:$0xf0]  ;;  %v3691_v11 = vor.u32 %v4192_v5, %v3688_v6  ;;  %v4156_v14 = vld [vmem:[%s4614_s5 + $0x5a4] sm:$0xf] }
  0x8f   : > { %2021 = vmatpush.bf16.msra.mxu1 %v2955_v56  ;;  %v3416_v13 = vld [vmem:[%s4614_s5 + $0x4b0] sm:$0xf0]  ;;  %v3819_v15 = vor.u32 %v4224_v7, %v3816_v8  ;;  %v4188_v17 = vld [vmem:[%s4614_s5 + $0x6a4] sm:$0xf] }
  0x90   : > { %2034 = vmatpush.bf16.msra.mxu2 %v3083_v57  ;;  %v3544_v16 = vld [vmem:[%s4614_s5 + $0x5b0] sm:$0xf0]  ;;  %v4220_v19 = vld [vmem:[%s4614_s5 + $0x7a4] sm:$0xf]  ;;  %v3419_v24 = vor.u32 %v4124_v12, %v3416_v13 }
  0x91   : > { %2047 = vmatpush.bf16.msra.mxu3 %v3211_v60  ;;  %v3672_v18 = vld [vmem:[%s4614_s5 + $0x6b0] sm:$0xf0]  ;;  %2009 = vmatmul.bf16.vlgmr.msra.gmra.mxu0 %v4734_v21  ;;  %v3547_v25 = vor.u32 %v4156_v14, %v3544_v16  ;;  %v4120_v28 = vld [vmem:[%s4614_s5 + $0x484] sm:$0xf] }
  0x92   : > { %2053 = vmatpush.bf16.msrb.mxu0 %v3451_v61  ;;  %v3800_v23 = vld [vmem:[%s4614_s5 + $0x7b0] sm:$0xf0]  ;;  %2022 = vmatmul.bf16.vlgmr.msra.gmra.mxu1 %v4741_v26  ;;  %v3675_v27 = vor.u32 %v4188_v17, %v3672_v18  ;;  %v4152_v33 = vld [vmem:[%s4614_s5 + $0x584] sm:$0xf] }
  0x93   : > { %2066 = vmatpush.bf16.msrb.mxu1 %v3579_v62  ;;  %2035 = vmatmul.bf16.vlgmr.msra.gmra.mxu2 %v4732_v20  ;;  %v3400_v30 = vld [vmem:[%s4614_s5 + $0x490] sm:$0xf0]  ;;  %v3803_v34 = vor.u32 %v4220_v19, %v3800_v23  ;;  %v4184_v36 = vld [vmem:[%s4614_s5 + $0x684] sm:$0xf] }
  0x94   : > { %2079 = vmatpush.bf16.msrb.mxu2 %v3707_v63  ;;  %2048 = vmatmul.bf16.vlgmr.msra.gmra.mxu3 %v4736_v22  ;;  %v3528_v35 = vld [vmem:[%s4614_s5 + $0x590] sm:$0xf0]  ;;  %v4216_v39 = vld [vmem:[%s4614_s5 + $0x784] sm:$0xf]  ;;  %v3403_v41 = vor.u32 %v4120_v28, %v3400_v30  ;;  %v2942_v30 = vld [vmem:[%s4614_s5 + $0xe8] sm:$0xf] }
  0x95   : > { %2092 = vmatpush.bf16.msrb.mxu3 %v3835_v3  ;;  %v3656_v37 = vld [vmem:[%s4614_s5 + $0x690] sm:$0xf0]  ;;  %v3531_v42 = vor.u32 %v4152_v33, %v3528_v35  ;;  %v4116_v44 = vld [vmem:[%s4614_s5 + $0x464] sm:$0xf]  ;;  %v4007_v33 = vld [vmem:[%s4614_s5 + $0xf4] sm:$0xf0] }
  0x96   : > { %2054 = vmatpush.bf16.msrb.mxu0 %v3435_v9  ;;  %v3784_v40 = vld [vmem:[%s4614_s5 + $0x790] sm:$0xf0]  ;;  %v3659_v43 = vor.u32 %v4184_v36, %v3656_v37  ;;  %v4148_v46 = vld [vmem:[%s4614_s5 + $0x564] sm:$0xf]  ;;  %v4039_v36 = vld [vmem:[%s4614_s5 + $0x1f4] sm:$0xf0] }
  0x97   : > { %2067 = vmatpush.bf16.msrb.mxu1 %v3563_v10  ;;  %v3384_v45 = vld [vmem:[%s4614_s5 + $0x470] sm:$0xf0]  ;;  %v3787_v47 = vor.u32 %v4216_v39, %v3784_v40  ;;  %v4180_v49 = vld [vmem:[%s4614_s5 + $0x664] sm:$0xf]  ;;  %v3198_v37 = vld [vmem:[%s4614_s5 + $0x2e8] sm:$0xf] }
  0x98   : > { %2080 = vmatpush.bf16.msrb.mxu2 %v3691_v11  ;;  %v3512_v48 = vld [vmem:[%s4614_s5 + $0x570] sm:$0xf0]  ;;  %v4212_v51 = vld [vmem:[%s4614_s5 + $0x764] sm:$0xf]  ;;  %v3387_v53 = vor.u32 %v4116_v44, %v3384_v45  ;;  %v4071_v39 = vld [vmem:[%s4614_s5 + $0x2f4] sm:$0xf0]  ;;  %v2943_v45 = vor.u32 %v4007_v33, %v2942_v30 }
  0x99   : > { %2093 = vmatpush.bf16.msrb.mxu3 %v3819_v15  ;;  %v3640_v50 = vld [vmem:[%s4614_s5 + $0x670] sm:$0xf0]  ;;  %v3515_v54 = vor.u32 %v4148_v46, %v3512_v48  ;;  %v4112_v56 = vld [vmem:[%s4614_s5 + $0x444] sm:$0xf]  ;;  %v2926_v48 = vld [vmem:[%s4614_s5 + $0xc8] sm:$0xf] }
  0x9a   : > { %2055 = vmatpush.bf16.msrb.mxu0 %v3419_v24  ;;  %v3768_v52 = vld [vmem:[%s4614_s5 + $0x770] sm:$0xf0]  ;;  %v3643_v55 = vor.u32 %v4180_v49, %v3640_v50  ;;  %v4144_v58 = vld [vmem:[%s4614_s5 + $0x544] sm:$0xf]  ;;  %v4003_v49 = vld [vmem:[%s4614_s5 + $0xd4] sm:$0xf0] }
  0x9b   : > { %2068 = vmatpush.bf16.msrb.mxu1 %v3547_v25  ;;  %v3368_v57 = vld [vmem:[%s4614_s5 + $0x450] sm:$0xf0]  ;;  %v3771_v59 = vor.u32 %v4212_v51, %v3768_v52  ;;  %v4176_v61 = vld [vmem:[%s4614_s5 + $0x644] sm:$0xf]  ;;  %v3054_v50 = vld [vmem:[%s4614_s5 + $0x1c8] sm:$0xf] }
  0x9c   : > { %2081 = vmatpush.bf16.msrb.mxu2 %v3675_v27  ;;  %v3496_v60 = vld [vmem:[%s4614_s5 + $0x550] sm:$0xf0]  ;;  %v4208_v63 = vld [vmem:[%s4614_s5 + $0x744] sm:$0xf]  ;;  %v3371_v1 = vor.u32 %v4112_v56, %v3368_v57  ;;  %v4035_v52 = vld [vmem:[%s4614_s5 + $0x1d4] sm:$0xf0]  ;;  %v2927_v57 = vor.u32 %v4003_v49, %v2926_v48 }
  0x9d   : > { %2094 = vmatpush.bf16.msrb.mxu3 %v3803_v34  ;;  %v3624_v62 = vld [vmem:[%s4614_s5 + $0x650] sm:$0xf0]  ;;  %v3499_v2 = vor.u32 %v4144_v58, %v3496_v60  ;;  %v4108_v4 = vld [vmem:[%s4614_s5 + $0x424] sm:$0xf]  ;;  %v3070_v34 = vld [vmem:[%s4614_s5 + $0x1e8] sm:$0xf]  ;;  %v3055_v58 = vor.u32 %v4035_v52, %v3054_v50 }
  0x9e   : > { %2056 = vmatpush.bf16.msrb.mxu0 %v3403_v41  ;;  %v3752_v0 = vld [vmem:[%s4614_s5 + $0x750] sm:$0xf0]  ;;  %v3627_v3 = vor.u32 %v4176_v61, %v3624_v62  ;;  %v4140_v6 = vld [vmem:[%s4614_s5 + $0x524] sm:$0xf]  ;;  %v3071_v46 = vor.u32 %v4039_v36, %v3070_v34  ;;  %v4099_v56 = vld [vmem:[%s4614_s5 + $0x3d4] sm:$0xf0] }
  0x9f   : > { %2069 = vmatpush.bf16.msrb.mxu1 %v3531_v42  ;;  %v3352_v5 = vld [vmem:[%s4614_s5 + $0x430] sm:$0xf0]  ;;  %v3755_v7 = vor.u32 %v4208_v63, %v3752_v0  ;;  %v4172_v9 = vld [vmem:[%s4614_s5 + $0x624] sm:$0xf]  ;;  %v3326_v42 = vld [vmem:[%s4614_s5 + $0x3e8] sm:$0xf] }
  0xa0   : > { %2082 = vmatpush.bf16.msrb.mxu2 %v3659_v43  ;;  %v3480_v8 = vld [vmem:[%s4614_s5 + $0x530] sm:$0xf0]  ;;  %v4204_v11 = vld [vmem:[%s4614_s5 + $0x724] sm:$0xf]  ;;  %v3355_v13 = vor.u32 %v4108_v4, %v3352_v5  ;;  %v4103_v43 = vld [vmem:[%s4614_s5 + $0x3f4] sm:$0xf0] }
  0xa1   : > { %2095 = vmatpush.bf16.msrb.mxu3 %v3787_v47  ;;  %v3608_v10 = vld [vmem:[%s4614_s5 + $0x630] sm:$0xf0]  ;;  %v4104_v14 = vld [vmem:[%s4614_s5 + $0x404] sm:$0xf]  ;;  %v3483_v16 = vor.u32 %v4140_v6, %v3480_v8  ;;  %v3199_v47 = vor.u32 %v4071_v39, %v3198_v37  ;;  %v3327_v51 = vor.u32 %v4103_v43, %v3326_v42  ;;  %v2910_v60 = vld [vmem:[%s4614_s5 + $0xa8] sm:$0xf] }
  0xa2   : > { %2057 = vmatpush.bf16.msrb.mxu0 %v3387_v53  ;;  %v3736_v12 = vld [vmem:[%s4614_s5 + $0x730] sm:$0xf0]  ;;  %v3611_v17 = vor.u32 %v4172_v9, %v3608_v10  ;;  %v4136_v18 = vld [vmem:[%s4614_s5 + $0x504] sm:$0xf]  ;;  %v3182_v53 = vld [vmem:[%s4614_s5 + $0x2c8] sm:$0xf] }
  0xa3   : > { %2070 = vmatpush.bf16.msrb.mxu1 %v3515_v54  ;;  %v3336_v15 = vld [vmem:[%s4614_s5 + $0x410] sm:$0xf0]  ;;  %v4168_v23 = vld [vmem:[%s4614_s5 + $0x604] sm:$0xf]  ;;  %v3739_v24 = vor.u32 %v4204_v11, %v3736_v12  ;;  %v4067_v54 = vld [vmem:[%s4614_s5 + $0x2d4] sm:$0xf0] }
  0xa4   : > { %2083 = vmatpush.bf16.msrb.mxu2 %v3643_v55  ;;  %v3464_v19 = vld [vmem:[%s4614_s5 + $0x510] sm:$0xf0]  ;;  %v4200_v27 = vld [vmem:[%s4614_s5 + $0x704] sm:$0xf]  ;;  %v3339_v35 = vor.u32 %v4104_v14, %v3336_v15  ;;  %v3310_v55 = vld [vmem:[%s4614_s5 + $0x3c8] sm:$0xf] }
  0xa5   : > { %2096 = vmatpush.bf16.msrb.mxu3 %v3771_v59  ;;  %v3592_v25 = vld [vmem:[%s4614_s5 + $0x610] sm:$0xf0]  ;;  %v3467_v40 = vor.u32 %v4136_v18, %v3464_v19  ;;  %v3183_v59 = vor.u32 %v4067_v54, %v3182_v53  ;;  %v3999_v61 = vld [vmem:[%s4614_s5 + $0xb4] sm:$0xf0]  ;;  %v3038_v62 = vld [vmem:[%s4614_s5 + $0x1a8] sm:$0xf]  ;;  %v3311_v63 = vor.u32 %v4099_v56, %v3310_v55 }
  0xa6   : > { %2058 = vmatpush.bf16.msrb.mxu0 %v3371_v1  ;;  %v3720_v28 = vld [vmem:[%s4614_s5 + $0x710] sm:$0xf0]  ;;  %v3595_v41 = vor.u32 %v4168_v23, %v3592_v25  ;;  %v4031_v0 = vld [vmem:[%s4614_s5 + $0x1b4] sm:$0xf0]  ;;  %v3166_v1 = vld [vmem:[%s4614_s5 + $0x2a8] sm:$0xf] }
  0xa7   : > { %2071 = vmatpush.bf16.msrb.mxu1 %v3499_v2  ;;  %v3723_v44 = vor.u32 %v4200_v27, %v3720_v28  ;;  %v4063_v2 = vld [vmem:[%s4614_s5 + $0x2b4] sm:$0xf0]  ;;  %v3039_v5 = vor.u32 %v4031_v0, %v3038_v62  ;;  %v3022_v8 = vld [vmem:[%s4614_s5 + $0x188] sm:$0xf] }
  0xa8   : > { %2084 = vmatpush.bf16.msrb.mxu2 %v3627_v3  ;;  %v3294_v3 = vld [vmem:[%s4614_s5 + $0x3a8] sm:$0xf]  ;;  %v4095_v4 = vld [vmem:[%s4614_s5 + $0x3b4] sm:$0xf0]  ;;  %v3167_v6 = vor.u32 %v4063_v2, %v3166_v1 }
  0xa9   : > { %2097 = vmatpush.bf16.msrb.mxu3 %v3755_v7  ;;  %v2894_v7 = vld [vmem:[%s4614_s5 + $0x88] sm:$0xf]  ;;  %v4027_v9 = vld [vmem:[%s4614_s5 + $0x194] sm:$0xf0] }
  0xaa   : > { %2059 = vmatpush.bf16.msrb.mxu0 %v3355_v13  ;;  %v3150_v10 = vld [vmem:[%s4614_s5 + $0x288] sm:$0xf]  ;;  %v4059_v11 = vld [vmem:[%s4614_s5 + $0x294] sm:$0xf0]  ;;  %v3023_v14 = vor.u32 %v4027_v9, %v3022_v8 }
  0xab   : > { %2072 = vmatpush.bf16.msrb.mxu1 %v3483_v16  ;;  %v4091_v12 = vld [vmem:[%s4614_s5 + $0x394] sm:$0xf0]  ;;  %v3151_v15 = vor.u32 %v4059_v11, %v3150_v10  ;;  %v2878_v16 = vld [vmem:[%s4614_s5 + $0x68] sm:$0xf] }
  0xac   : > { %2085 = vmatpush.bf16.msrb.mxu2 %v3611_v17  ;;  %v3991_v17 = vld [vmem:[%s4614_s5 + $0x74] sm:$0xf0]  ;;  %v3006_v18 = vld [vmem:[%s4614_s5 + $0x168] sm:$0xf] }
  0xad   : > { %2098 = vmatpush.bf16.msrb.mxu3 %v3739_v24  ;;  %v4023_v23 = vld [vmem:[%s4614_s5 + $0x174] sm:$0xf0]  ;;  %v3134_v24 = vld [vmem:[%s4614_s5 + $0x268] sm:$0xf]  ;;  %v2879_v30 = vor.u32 %v3991_v17, %v2878_v16 }
  0xae   : > { %2060 = vmatpush.bf16.msrb.mxu0 %v3339_v35  ;;  %v4055_v25 = vld [vmem:[%s4614_s5 + $0x274] sm:$0xf0]  ;;  %v3262_v27 = vld [vmem:[%s4614_s5 + $0x368] sm:$0xf]  ;;  %v3007_v33 = vor.u32 %v4023_v23, %v3006_v18 }
  0xaf   : > { %2073 = vmatpush.bf16.msrb.mxu1 %v3467_v40  ;;  %v4087_v28 = vld [vmem:[%s4614_s5 + $0x374] sm:$0xf0]  ;;  %v3135_v34 = vor.u32 %v4055_v25, %v3134_v24  ;;  %v2862_v35 = vld [vmem:[%s4614_s5 + $0x48] sm:$0xf] }
  0xb0   : > { %2086 = vmatpush.bf16.msrb.mxu2 %v3595_v41  ;;  %v3987_v36 = vld [vmem:[%s4614_s5 + $0x54] sm:$0xf0]  ;;  %v2990_v37 = vld [vmem:[%s4614_s5 + $0x148] sm:$0xf]  ;;  %v3263_v39 = vor.u32 %v4087_v28, %v3262_v27 }
  0xb1   : > { %2099 = vmatpush.bf16.msrb.mxu3 %v3723_v44  ;;  %2061 = vmatmul.bf16.vlgmr.msrb.gmra.mxu0 %v4790_v31  ;;  %v3995_v31 = vld [vmem:[%s4614_s5 + $0x94] sm:$0xf0]  ;;  %v3118_v41 = vld [vmem:[%s4614_s5 + $0x248] sm:$0xf] }
  0xb2   : > { %2105 = vmatpush.bf16.msra.mxu0 %v2943_v45  ;;  %2074 = vmatmul.bf16.vlgmr.msrb.gmra.mxu1 %v4797_v38  ;;  %v3278_v38 = vld [vmem:[%s4614_s5 + $0x388] sm:$0xf]  ;;  %v2895_v13 = vor.u32 %v3995_v31, %v2894_v7  ;;  %v4019_v40 = vld [vmem:[%s4614_s5 + $0x154] sm:$0xf0]  ;;  %v2863_v45 = vor.u32 %v3987_v36, %v2862_v35 }
  0xb3   : > { %2118 = vmatpush.bf16.msra.mxu1 %v3071_v46  ;;  %2087 = vmatmul.bf16.vlgmr.msrb.gmra.mxu2 %v4788_v29  ;;  %v2911_v29 = vor.u32 %v3999_v61, %v2910_v60  ;;  %v3279_v19 = vor.u32 %v4091_v12, %v3278_v38  ;;  %v4051_v42 = vld [vmem:[%s4614_s5 + $0x254] sm:$0xf0]  ;;  %v3246_v43 = vld [vmem:[%s4614_s5 + $0x348] sm:$0xf]  ;;  %v2991_v46 = vor.u32 %v4019_v40, %v2990_v37 }
  0xb4   : > { %2131 = vmatpush.bf16.msra.mxu2 %v3199_v47  ;;  %2100 = vmatmul.bf16.vlgmr.msrb.gmra.mxu3 %v4792_v32  ;;  %v3295_v32 = vor.u32 %v4095_v4, %v3294_v3  ;;  %v4083_v44 = vld [vmem:[%s4614_s5 + $0x354] sm:$0xf0]  ;;  %v3119_v47 = vor.u32 %v4051_v42, %v3118_v41  ;;  %v2846_v48 = vld [vmem:[%s4614_s5 + $0x28] sm:$0xf] }
  0xb5   : > { %2144 = vmatpush.bf16.msra.mxu3 %v3327_v51  ;;  %v3983_v49 = vld [vmem:[%s4614_s5 + $0x34] sm:$0xf0]  ;;  %v2974_v50 = vld [vmem:[%s4614_s5 + $0x128] sm:$0xf]  ;;  %v3247_v51 = vor.u32 %v4083_v44, %v3246_v43 }
  0xb6   : > { %2106 = vmatpush.bf16.msra.mxu0 %v2927_v57  ;;  %v4015_v52 = vld [vmem:[%s4614_s5 + $0x134] sm:$0xf0]  ;;  %v3102_v53 = vld [vmem:[%s4614_s5 + $0x228] sm:$0xf]  ;;  %v2847_v57 = vor.u32 %v3983_v49, %v2846_v48 }
  0xb7   : > { %2119 = vmatpush.bf16.msra.mxu1 %v3055_v58  ;;  %v4047_v54 = vld [vmem:[%s4614_s5 + $0x234] sm:$0xf0]  ;;  %v3230_v55 = vld [vmem:[%s4614_s5 + $0x328] sm:$0xf]  ;;  %v2975_v60 = vor.u32 %v4015_v52, %v2974_v50 }
  0xb8   : > { %2132 = vmatpush.bf16.msra.mxu2 %v3183_v59  ;;  %v4079_v56 = vld [vmem:[%s4614_s5 + $0x334] sm:$0xf0]  ;;  %v2830_v58 = vld [vmem:[%s4614_s5 + $0x8] sm:$0xf]  ;;  %v3103_v61 = vor.u32 %v4047_v54, %v3102_v53 }
  0xb9   : > { %2145 = vmatpush.bf16.msra.mxu3 %v3311_v63  ;;  %v3979_v59 = vld [vmem:[%s4614_s5 + $0x14] sm:$0xf0]  ;;  %v2958_v62 = vld [vmem:[%s4614_s5 + $0x108] sm:$0xf]  ;;  %v3231_v1 = vor.u32 %v4079_v56, %v3230_v55 }
  0xba   : > { %2107 = vmatpush.bf16.msra.mxu0 %v2911_v29  ;;  %v4011_v63 = vld [vmem:[%s4614_s5 + $0x114] sm:$0xf0]  ;;  %v3086_v0 = vld [vmem:[%s4614_s5 + $0x208] sm:$0xf]  ;;  %v2831_v7 = vor.u32 %v3979_v59, %v2830_v58 }
  0xbb   : > { %2120 = vmatpush.bf16.msra.mxu1 %v3039_v5  ;;  %v4043_v2 = vld [vmem:[%s4614_s5 + $0x214] sm:$0xf0]  ;;  %v3214_v3 = vld [vmem:[%s4614_s5 + $0x308] sm:$0xf]  ;;  %v2959_v9 = vor.u32 %v4011_v63, %v2958_v62 }
  0xbc   : > { %2133 = vmatpush.bf16.msra.mxu2 %v3167_v6  ;;  %v4075_v4 = vld [vmem:[%s4614_s5 + $0x314] sm:$0xf0]  ;;  %v3454_v29 = vld [vmem:[%s4614_s5 + $0x4e8] sm:$0xf]  ;;  %v3087_v10 = vor.u32 %v4043_v2, %v3086_v0 }
  0xbd   : > { %2146 = vmatpush.bf16.msra.mxu3 %v3295_v32  ;;  %v4135_v5 = vld [vmem:[%s4614_s5 + $0x4f4] sm:$0xf0]  ;;  %v3582_v6 = vld [vmem:[%s4614_s5 + $0x5e8] sm:$0xf]  ;;  %v3215_v12 = vor.u32 %v4075_v4, %v3214_v3 }
  0xbe   : > { %2108 = vmatpush.bf16.msra.mxu0 %v2895_v13  ;;  %v4167_v31 = vld [vmem:[%s4614_s5 + $0x5f4] sm:$0xf0]  ;;  %v3710_v8 = vld [vmem:[%s4614_s5 + $0x6e8] sm:$0xf]  ;;  %v3455_v13 = vor.u32 %v4135_v5, %v3454_v29 }
  0xbf   : > { %2121 = vmatpush.bf16.msra.mxu1 %v3023_v14  ;;  %v4199_v32 = vld [vmem:[%s4614_s5 + $0x6f4] sm:$0xf0]  ;;  %v3838_v11 = vld [vmem:[%s4614_s5 + $0x7e8] sm:$0xf]  ;;  %v3583_v14 = vor.u32 %v4167_v31, %v3582_v6 }
  0xc0   : > { %2134 = vmatpush.bf16.msra.mxu2 %v3151_v15  ;;  %v4231_v38 = vld [vmem:[%s4614_s5 + $0x7f4] sm:$0xf0]  ;;  %v3711_v15 = vor.u32 %v4199_v32, %v3710_v8  ;;  %v3438_v16 = vld [vmem:[%s4614_s5 + $0x4c8] sm:$0xf] }
  0xc1   : > { %2147 = vmatpush.bf16.msra.mxu3 %v3279_v19  ;;  %v4131_v17 = vld [vmem:[%s4614_s5 + $0x4d4] sm:$0xf0]  ;;  %v3566_v18 = vld [vmem:[%s4614_s5 + $0x5c8] sm:$0xf]  ;;  %v3839_v19 = vor.u32 %v4231_v38, %v3838_v11 }
  0xc2   : > { %2109 = vmatpush.bf16.msra.mxu0 %v2879_v30  ;;  %v4163_v23 = vld [vmem:[%s4614_s5 + $0x5d4] sm:$0xf0]  ;;  %v3694_v24 = vld [vmem:[%s4614_s5 + $0x6c8] sm:$0xf]  ;;  %v3439_v30 = vor.u32 %v4131_v17, %v3438_v16 }
  0xc3   : > { %2122 = vmatpush.bf16.msra.mxu1 %v3007_v33  ;;  %v4195_v25 = vld [vmem:[%s4614_s5 + $0x6d4] sm:$0xf0]  ;;  %v3822_v27 = vld [vmem:[%s4614_s5 + $0x7c8] sm:$0xf]  ;;  %v3567_v33 = vor.u32 %v4163_v23, %v3566_v18 }
  0xc4   : > { %2135 = vmatpush.bf16.msra.mxu2 %v3135_v34  ;;  %v4227_v28 = vld [vmem:[%s4614_s5 + $0x7d4] sm:$0xf0]  ;;  %v3695_v34 = vor.u32 %v4195_v25, %v3694_v24  ;;  %v3422_v35 = vld [vmem:[%s4614_s5 + $0x4a8] sm:$0xf] }
  0xc5   : > { %2148 = vmatpush.bf16.msra.mxu3 %v3263_v39  ;;  %v4127_v36 = vld [vmem:[%s4614_s5 + $0x4b4] sm:$0xf0]  ;;  %v3550_v37 = vld [vmem:[%s4614_s5 + $0x5a8] sm:$0xf]  ;;  %v3823_v39 = vor.u32 %v4227_v28, %v3822_v27 }
  0xc6   : > { %2110 = vmatpush.bf16.msra.mxu0 %v2863_v45  ;;  %v4159_v40 = vld [vmem:[%s4614_s5 + $0x5b4] sm:$0xf0]  ;;  %v3678_v41 = vld [vmem:[%s4614_s5 + $0x6a8] sm:$0xf]  ;;  %v3423_v45 = vor.u32 %v4127_v36, %v3422_v35 }
  0xc7   : > { %2123 = vmatpush.bf16.msra.mxu1 %v2991_v46  ;;  %v4191_v42 = vld [vmem:[%s4614_s5 + $0x6b4] sm:$0xf0]  ;;  %v3806_v43 = vld [vmem:[%s4614_s5 + $0x7a8] sm:$0xf]  ;;  %v3551_v46 = vor.u32 %v4159_v40, %v3550_v37 }
  0xc8   : > { %2136 = vmatpush.bf16.msra.mxu2 %v3119_v47  ;;  %v4223_v44 = vld [vmem:[%s4614_s5 + $0x7b4] sm:$0xf0]  ;;  %v3679_v47 = vor.u32 %v4191_v42, %v3678_v41  ;;  %v3534_v49 = vld [vmem:[%s4614_s5 + $0x588] sm:$0xf] }
  0xc9   : > { %2149 = vmatpush.bf16.msra.mxu3 %v3247_v51  ;;  %v4123_v48 = vld [vmem:[%s4614_s5 + $0x494] sm:$0xf0]  ;;  %v3790_v52 = vld [vmem:[%s4614_s5 + $0x788] sm:$0xf] }
  0xca   : > { %2111 = vmatpush.bf16.msra.mxu0 %v2847_v57  ;;  %v4155_v50 = vld [vmem:[%s4614_s5 + $0x594] sm:$0xf0]  ;;  %v3390_v56 = vld [vmem:[%s4614_s5 + $0x468] sm:$0xf] }
  0xcb   : > { %2124 = vmatpush.bf16.msra.mxu1 %v2975_v60  ;;  %v4187_v51 = vld [vmem:[%s4614_s5 + $0x694] sm:$0xf0]  ;;  %v3535_v54 = vor.u32 %v4155_v50, %v3534_v49  ;;  %v3518_v58 = vld [vmem:[%s4614_s5 + $0x568] sm:$0xf]  ;;  %v4069_v50 = vld [vmem:[%s4614_s5 + $0x2ec] sm:$0xf] }
  0xcc   : > { %2137 = vmatpush.bf16.msra.mxu2 %v3103_v61  ;;  %v4119_v57 = vld [vmem:[%s4614_s5 + $0x474] sm:$0xf0]  ;;  %v3646_v61 = vld [vmem:[%s4614_s5 + $0x668] sm:$0xf] }
  0xcd   : > { %2150 = vmatpush.bf16.msra.mxu3 %v3231_v1  ;;  %v4151_v60 = vld [vmem:[%s4614_s5 + $0x574] sm:$0xf0]  ;;  %v3774_v63 = vld [vmem:[%s4614_s5 + $0x768] sm:$0xf]  ;;  %v3391_v1 = vor.u32 %v4119_v57, %v3390_v56  ;;  %v1906_v11 = vpop.f32.mrf.mxu0 }
  0xce   : > { %2112 = vmatpush.bf16.msra.mxu0 %v2831_v7  ;;  %v4183_v62 = vld [vmem:[%s4614_s5 + $0x674] sm:$0xf0]  ;;  %v3519_v2 = vor.u32 %v4151_v60, %v3518_v58  ;;  %v3374_v4 = vld [vmem:[%s4614_s5 + $0x448] sm:$0xf] }
  0xcf   : > { %2125 = vmatpush.bf16.msra.mxu1 %v2959_v9  ;;  %v4215_v0 = vld [vmem:[%s4614_s5 + $0x774] sm:$0xf0]  ;;  %v3647_v3 = vor.u32 %v4183_v62, %v3646_v61  ;;  %v3502_v5 = vld [vmem:[%s4614_s5 + $0x548] sm:$0xf]  ;;  %v4001_v61 = vld [vmem:[%s4614_s5 + $0xcc] sm:$0xf] }
  0xd0   : > { %2138 = vmatpush.bf16.msra.mxu2 %v3087_v10  ;;  %v4115_v29 = vld [vmem:[%s4614_s5 + $0x454] sm:$0xf0]  ;;  %v3775_v6 = vor.u32 %v4215_v0, %v3774_v63  ;;  %v3630_v31 = vld [vmem:[%s4614_s5 + $0x648] sm:$0xf]  ;;  %v2928_v62 = vld [vmem:[%s4614_s5 + $0xd8] sm:$0xf0] }
  0xd1   : > { %2151 = vmatpush.bf16.msra.mxu3 %v3215_v12  ;;  %2113 = vmatmul.bf16.vlgmr.msra.gmra.mxu0 %v4734_v21  ;;  %v3807_v21 = vor.u32 %v4223_v44, %v3806_v43  ;;  %v4147_v7 = vld [vmem:[%s4614_s5 + $0x554] sm:$0xf0]  ;;  %v3758_v32 = vld [vmem:[%s4614_s5 + $0x748] sm:$0xf]  ;;  %v3375_v10 = vor.u32 %v4115_v29, %v3374_v4  ;;  %v4033_v63 = vld [vmem:[%s4614_s5 + $0x1cc] sm:$0xf] }
  0xd2   : > { %2157 = vmatpush.bf16.msrb.mxu0 %v3455_v13  ;;  %2126 = vmatmul.bf16.vlgmr.msra.gmra.mxu1 %v4741_v26  ;;  %v4219_v26 = vld [vmem:[%s4614_s5 + $0x794] sm:$0xf0]  ;;  %v3503_v38 = vor.u32 %v4147_v7, %v3502_v5  ;;  %v3358_v13 = vld [vmem:[%s4614_s5 + $0x428] sm:$0xf]  ;;  %v4097_v4 = vld [vmem:[%s4614_s5 + $0x3cc] sm:$0xf] }
  0xd3   : > { %2170 = vmatpush.bf16.msrb.mxu1 %v3583_v14  ;;  %2139 = vmatmul.bf16.vlgmr.msra.gmra.mxu2 %v4732_v20  ;;  %v3406_v20 = vld [vmem:[%s4614_s5 + $0x488] sm:$0xf]  ;;  %v3791_v59 = vor.u32 %v4219_v26, %v3790_v52  ;;  %v4179_v8 = vld [vmem:[%s4614_s5 + $0x654] sm:$0xf0]  ;;  %v3312_v29 = vld [vmem:[%s4614_s5 + $0x3d8] sm:$0xf0] }
  0xd4   : > { %2183 = vmatpush.bf16.msrb.mxu2 %v3711_v15  ;;  %2152 = vmatmul.bf16.vlgmr.msra.gmra.mxu3 %v4736_v22  ;;  %v3662_v22 = vld [vmem:[%s4614_s5 + $0x688] sm:$0xf]  ;;  %v3407_v53 = vor.u32 %v4123_v48, %v3406_v20  ;;  %v4211_v9 = vld [vmem:[%s4614_s5 + $0x754] sm:$0xf0]  ;;  %v3631_v12 = vor.u32 %v4179_v8, %v3630_v31  ;;  %v2944_v20 = vld [vmem:[%s4614_s5 + $0xf8] sm:$0xf0] }
  0xd5   : > { %2196 = vmatpush.bf16.msrb.mxu3 %v3839_v19  ;;  %v3663_v55 = vor.u32 %v4187_v51, %v3662_v22  ;;  %v4111_v14 = vld [vmem:[%s4614_s5 + $0x434] sm:$0xf0]  ;;  %v3486_v15 = vld [vmem:[%s4614_s5 + $0x528] sm:$0xf]  ;;  %v3759_v17 = vor.u32 %v4211_v9, %v3758_v32  ;;  %v4037_v48 = vld [vmem:[%s4614_s5 + $0x1ec] sm:$0xf]  ;;  %v1908_v52 = vpop.f32.mrf.mxu0 }
  0xd6   : > { %2158 = vmatpush.bf16.msrb.mxu0 %v3439_v30  ;;  %v4143_v18 = vld [vmem:[%s4614_s5 + $0x534] sm:$0xf0]  ;;  %v3614_v19 = vld [vmem:[%s4614_s5 + $0x628] sm:$0xf]  ;;  %v3359_v28 = vor.u32 %v4111_v14, %v3358_v13  ;;  %v3200_v22 = vld [vmem:[%s4614_s5 + $0x2f8] sm:$0xf0] }
  0xd7   : > { %2171 = vmatpush.bf16.msrb.mxu1 %v3567_v33  ;;  %v4175_v23 = vld [vmem:[%s4614_s5 + $0x634] sm:$0xf0]  ;;  %v3742_v25 = vld [vmem:[%s4614_s5 + $0x728] sm:$0xf]  ;;  %v3203_v60 = vor.u32 %v4069_v50, %v3200_v22  ;;  %v3997_v32 = vld [vmem:[%s4614_s5 + $0xac] sm:$0xf] }
  0xd8   : > { %2184 = vmatpush.bf16.msrb.mxu2 %v3695_v34  ;;  %v4207_v27 = vld [vmem:[%s4614_s5 + $0x734] sm:$0xf0]  ;;  %v3342_v30 = vld [vmem:[%s4614_s5 + $0x408] sm:$0xf]  ;;  %v3487_v34 = vor.u32 %v4143_v18, %v3486_v15  ;;  %v3615_v35 = vor.u32 %v4175_v23, %v3614_v19  ;;  %v2912_v9 = vld [vmem:[%s4614_s5 + $0xb8] sm:$0xf0] }
  0xd9   : > { %2197 = vmatpush.bf16.msrb.mxu3 %v3823_v39  ;;  %v4107_v33 = vld [vmem:[%s4614_s5 + $0x414] sm:$0xf0]  ;;  %v3470_v36 = vld [vmem:[%s4614_s5 + $0x508] sm:$0xf]  ;;  %v3743_v41 = vor.u32 %v4207_v27, %v3742_v25  ;;  %v4061_v13 = vld [vmem:[%s4614_s5 + $0x2ac] sm:$0xf]  ;;  %v2915_v19 = vor.u32 %v3997_v32, %v2912_v9 }
  0xda   : > { %2159 = vmatpush.bf16.msrb.mxu0 %v3423_v45  ;;  %v4139_v37 = vld [vmem:[%s4614_s5 + $0x514] sm:$0xf0]  ;;  %v3598_v39 = vld [vmem:[%s4614_s5 + $0x608] sm:$0xf]  ;;  %v3343_v49 = vor.u32 %v4107_v33, %v3342_v30  ;;  %v3168_v14 = vld [vmem:[%s4614_s5 + $0x2b8] sm:$0xf0] }
  0xdb   : > { %2172 = vmatpush.bf16.msrb.mxu1 %v3551_v46  ;;  %v4171_v42 = vld [vmem:[%s4614_s5 + $0x614] sm:$0xf0]  ;;  %v3726_v43 = vld [vmem:[%s4614_s5 + $0x708] sm:$0xf]  ;;  %v3471_v26 = vor.u32 %v4139_v37, %v3470_v36  ;;  %v5079_v15 = vld [vmem:[#allocation1 + $0x24] sm:$0xff]  ;;  %v3171_v25 = vor.u32 %v4061_v13, %v3168_v14 }
  0xdc   : > { %2185 = vmatpush.bf16.msrb.mxu2 %v3679_v47  ;;  %v4203_v44 = vld [vmem:[%s4614_s5 + $0x714] sm:$0xf0]  ;;  %v4005_v47 = vld [vmem:[%s4614_s5 + $0xec] sm:$0xf]  ;;  %v3296_v18 = vld [vmem:[%s4614_s5 + $0x3b8] sm:$0xf0] }
  0xdd   : > { %2198 = vmatpush.bf16.msrb.mxu3 %v3807_v21  ;;  %v3072_v21 = vld [vmem:[%s4614_s5 + $0x1f8] sm:$0xf0]  ;;  %v3727_v57 = vor.u32 %v4203_v44, %v3726_v43  ;;  %v2947_v58 = vor.u32 %v4005_v47, %v2944_v20  ;;  %v5087_v23 = vld [vmem:[#allocation1 + $0x2d] sm:$0xff] }
  0xde   : > { %2160 = vmatpush.bf16.msrb.mxu0 %v3407_v53  ;;  %v3599_v53 = vor.u32 %v4171_v42, %v3598_v39  ;;  %v3993_v27 = vld [vmem:[%s4614_s5 + $0x8c] sm:$0xf]  ;;  %v3152_v36 = vld [vmem:[%s4614_s5 + $0x298] sm:$0xf0] }
  0xdf   : > { %2173 = vmatpush.bf16.msrb.mxu1 %v3535_v54  ;;  %v1919_v16 = vpop.f32.mrf.mxu1  ;;  %v4101_v54 = vld [vmem:[%s4614_s5 + $0x3ec] sm:$0xf]  ;;  %v3280_v39 = vld [vmem:[%s4614_s5 + $0x398] sm:$0xf0] }
  0xe0   : > { %2186 = vmatpush.bf16.msrb.mxu2 %v3663_v55  ;;  %v1920_v24 = vadd.f32 %v1919_v16, %v1906_v11  ;;  %v3328_v55 = vld [vmem:[%s4614_s5 + $0x3f8] sm:$0xf0]  ;;  %v3315_v11 = vor.u32 %v4097_v4, %v3312_v29  ;;  %v4025_v30 = vld [vmem:[%s4614_s5 + $0x18c] sm:$0xf] }
  0xe1   : > { %2199 = vmatpush.bf16.msrb.mxu3 %v3791_v59  ;;  %v3075_v59 = vor.u32 %v4037_v48, %v3072_v21  ;;  %v3331_v0 = vor.u32 %v4101_v54, %v3328_v55  ;;  %v5082_v16 = vld [vmem:[#allocation1 + $0x3f] sm:$0xff]  ;;  %v4089_v37 = vld [vmem:[%s4614_s5 + $0x38c] sm:$0xf] }
  0xe2   : > { %2161 = vmatpush.bf16.msrb.mxu0 %v3391_v1  ;;  %v3056_v1 = vld [vmem:[%s4614_s5 + $0x1d8] sm:$0xf0]  ;;  %v3989_v44 = vld [vmem:[%s4614_s5 + $0x6c] sm:$0xf]  ;;  %v3283_v48 = vor.u32 %v4089_v37, %v3280_v39 }
  0xe3   : > { %2174 = vmatpush.bf16.msrb.mxu1 %v3519_v2  ;;  %v4065_v2 = vld [vmem:[%s4614_s5 + $0x2cc] sm:$0xf]  ;;  %v3059_v31 = vor.u32 %v4033_v63, %v3056_v1  ;;  %v3136_v50 = vld [vmem:[%s4614_s5 + $0x278] sm:$0xf0] }
  0xe4   : > { %2187 = vmatpush.bf16.msrb.mxu2 %v3647_v3  ;;  %v1932_v40 = vpop.f32.mrf.mxu2  ;;  %v1945_v46 = vpop.f32.mrf.mxu3  ;;  %v3184_v3 = vld [vmem:[%s4614_s5 + $0x2d8] sm:$0xf0]  ;;  %v4053_v21 = vld [vmem:[%s4614_s5 + $0x26c] sm:$0xf] }
  0xe5   : > { %2200 = vmatpush.bf16.msrb.mxu3 %v3775_v6  ;;  %v1933_v45 = vadd.f32 %v1932_v40, %v1920_v24  ;;  %v2931_v6 = vor.u32 %v4001_v61, %v2928_v62  ;;  %v3187_v8 = vor.u32 %v4065_v2, %v3184_v3  ;;  %v4085_v22 = vld [vmem:[%s4614_s5 + $0x36c] sm:$0xf]  ;;  %v3264_v52 = vld [vmem:[%s4614_s5 + $0x378] sm:$0xf0]  ;;  %v3139_v54 = vor.u32 %v4053_v21, %v3136_v50 }
  0xe6   : > { %2162 = vmatpush.bf16.msrb.mxu0 %v3375_v10  ;;  %v4029_v10 = vld [vmem:[%s4614_s5 + $0x1ac] sm:$0xf]  ;;  %v3120_v62 = vld [vmem:[%s4614_s5 + $0x258] sm:$0xf0] }
  0xe7   : > { %2175 = vmatpush.bf16.msrb.mxu1 %v3503_v38  ;;  %v5058_v51 = vadd.f32 %v1945_v46, %v1933_v45  ;;  %v1921_v56 = vpop.f32.mrf.mxu1  ;;  %v5073_v38 = vld [vmem:[#allocation1 + $0x36] sm:$0xff]  ;;  %v2880_v45 = vld [vmem:[%s4614_s5 + $0x78] sm:$0xf0] }
  0xe8   : > { %2188 = vmatpush.bf16.msrb.mxu2 %v3631_v12  ;;  %v3040_v12 = vld [vmem:[%s4614_s5 + $0x1b8] sm:$0xf0]  ;;  %v4021_v46 = vld [vmem:[%s4614_s5 + $0x16c] sm:$0xf] }
  0xe9   : > { %2201 = vmatpush.bf16.msrb.mxu3 %v3759_v17  ;;  %v4093_v17 = vld [vmem:[%s4614_s5 + $0x3ac] sm:$0xf]  ;;  %v3043_v24 = vor.u32 %v4029_v10, %v3040_v12  ;;  %v2864_v56 = vld [vmem:[%s4614_s5 + $0x58] sm:$0xf0] }
  0xea   : > { %2163 = vmatpush.bf16.msrb.mxu0 %v3359_v28  ;;  %v2896_v28 = vld [vmem:[%s4614_s5 + $0x98] sm:$0xf0]  ;;  %v3299_v33 = vor.u32 %v4093_v17, %v3296_v18  ;;  %v3985_v55 = vld [vmem:[%s4614_s5 + $0x4c] sm:$0xf] }
  0xeb   : > { %2176 = vmatpush.bf16.msrb.mxu1 %v3487_v34  ;;  %v3024_v34 = vld [vmem:[%s4614_s5 + $0x198] sm:$0xf0]  ;;  %v2899_v40 = vor.u32 %v3993_v27, %v2896_v28  ;;  %v4049_v61 = vld [vmem:[%s4614_s5 + $0x24c] sm:$0xf]  ;;  %v2867_v3 = vor.u32 %v3985_v55, %v2864_v56 }
  0xec   : > { %2189 = vmatpush.bf16.msrb.mxu2 %v3615_v35  ;;  %v1934_v5 = vpop.f32.mrf.mxu2  ;;  %v1947_v7 = vpop.f32.mrf.mxu3  ;;  %v4057_v35 = vld [vmem:[%s4614_s5 + $0x28c] sm:$0xf]  ;;  %v3027_v42 = vor.u32 %v4025_v30, %v3024_v34  ;;  %v3248_v2 = vld [vmem:[%s4614_s5 + $0x358] sm:$0xf0] }
  0xed   : > { %2202 = vmatpush.bf16.msrb.mxu3 %v3743_v41  ;;  %v3155_v43 = vor.u32 %v4057_v35, %v3152_v36  ;;  %v4081_v1 = vld [vmem:[%s4614_s5 + $0x34c] sm:$0xf]  ;;  %v2976_v10 = vld [vmem:[%s4614_s5 + $0x138] sm:$0xf0] }
  0xee   : > { %2164 = vmatpush.bf16.msrb.mxu0 %v3343_v49  ;;  %v1958_v41 = vpop.f32.mrf.mxu0  ;;  %v3008_v49 = vld [vmem:[%s4614_s5 + $0x178] sm:$0xf0]  ;;  %v3981_v7 = vld [vmem:[%s4614_s5 + $0x2c] sm:$0xf]  ;;  %v3251_v9 = vor.u32 %v4081_v1, %v3248_v2 }
  0xef   : > { %2177 = vmatpush.bf16.msrb.mxu1 %v3471_v26  ;;  %v1959_v47 = vadd.f32 %v1958_v41, %v5058_v51  ;;  %v1971_v20 = vpop.f32.mrf.mxu1  ;;  %v3011_v51 = vor.u32 %v4021_v46, %v3008_v49  ;;  %v3104_v12 = vld [vmem:[%s4614_s5 + $0x238] sm:$0xf0]  ;;  %v4077_v13 = vld [vmem:[%s4614_s5 + $0x32c] sm:$0xf] }
  0xf0   : > { %2190 = vmatpush.bf16.msrb.mxu2 %v3599_v53  ;;  %v2883_v53 = vor.u32 %v3989_v44, %v2880_v45  ;;  %v3232_v14 = vld [vmem:[%s4614_s5 + $0x338] sm:$0xf0]  ;;  %v3977_v18 = vld [vmem:[%s4614_s5 + $0xc] sm:$0xf] }
  0xf1   : > { %2203 = vmatpush.bf16.msrb.mxu3 %v3727_v57  ;;  %2165 = vmatmul.bf16.vlgmr.msrb.gmra.mxu0 %v5079_v15  ;;  %v1972_v26 = vadd.f32 %v1971_v20, %v1959_v47  ;;  %v4017_v57 = vld [vmem:[%s4614_s5 + $0x14c] sm:$0xf]  ;;  %v2960_v28 = vld [vmem:[%s4614_s5 + $0x118] sm:$0xf0]  ;;  %v3235_v34 = vor.u32 %v4077_v13, %v3232_v14 }
  0xf2   : > { %2209 = vmatpush.bf16.msra.mxu0 %v2947_v58  ;;  %2178 = vmatmul.bf16.vlgmr.msrb.gmra.mxu1 %v5087_v23  ;;  %v4009_v27 = vld [vmem:[%s4614_s5 + $0x10c] sm:$0xf]  ;;  %v3088_v35 = vld [vmem:[%s4614_s5 + $0x218] sm:$0xf0] }
  0xf3   : > { %2222 = vmatpush.bf16.msra.mxu1 %v3075_v59  ;;  %2191 = vmatmul.bf16.vlgmr.msrb.gmra.mxu2 %v5073_v38  ;;  %v3267_v59 = vor.u32 %v4085_v22, %v3264_v52  ;;  %v4041_v30 = vld [vmem:[%s4614_s5 + $0x20c] sm:$0xf]  ;;  %v3216_v37 = vld [vmem:[%s4614_s5 + $0x318] sm:$0xf0]  ;;  %v2963_v47 = vor.u32 %v4009_v27, %v2960_v28 }
  0xf4   : > { %2235 = vmatpush.bf16.msra.mxu2 %v3203_v60  ;;  %2204 = vmatmul.bf16.vlgmr.msrb.gmra.mxu3 %v5082_v16  ;;  %v2992_v60 = vld [vmem:[%s4614_s5 + $0x158] sm:$0xf0]  ;;  %v4073_v36 = vld [vmem:[%s4614_s5 + $0x30c] sm:$0xf]  ;;  %v3091_v20 = vor.u32 %v4041_v30, %v3088_v35 }
  0xf5   : > { %2248 = vmatpush.bf16.msra.mxu3 %v3331_v0  ;;  %v2995_v5 = vor.u32 %v4017_v57, %v2992_v60  ;;  %v3456_v41 = vld [vmem:[%s4614_s5 + $0x4f8] sm:$0xf0]  ;;  %v4197_v45 = vld [vmem:[%s4614_s5 + $0x6ec] sm:$0xf]  ;;  %v3219_v21 = vor.u32 %v4073_v36, %v3216_v37 }
  0xf6   : > { %2210 = vmatpush.bf16.msra.mxu0 %v2931_v6  ;;  %v1984_v58 = vpop.f32.mrf.mxu2  ;;  %v1960_v29 = vpop.f32.mrf.mxu0  ;;  %v3123_v6 = vor.u32 %v4049_v61, %v3120_v62  ;;  %v3584_v44 = vld [vmem:[%s4614_s5 + $0x5f8] sm:$0xf0]  ;;  %v4193_v56 = vld [vmem:[%s4614_s5 + $0x6cc] sm:$0xf] }
  0xf7   : > { %2223 = vmatpush.bf16.msra.mxu1 %v3059_v31  ;;  %v1985_v63 = vadd.f32 %v1984_v58, %v1972_v26  ;;  %v1997_v0 = vpop.f32.mrf.mxu3  ;;  %v2848_v31 = vld [vmem:[%s4614_s5 + $0x38] sm:$0xf0]  ;;  %v1973_v32 = vpop.f32.mrf.mxu1  ;;  %v4129_v26 = vld [vmem:[%s4614_s5 + $0x4cc] sm:$0xf] }
  0xf8   : > { %2236 = vmatpush.bf16.msra.mxu2 %v3187_v8  ;;  %v4013_v8 = vld [vmem:[%s4614_s5 + $0x12c] sm:$0xf]  ;;  %v2851_v17 = vor.u32 %v3981_v7, %v2848_v31  ;;  %v3712_v46 = vld [vmem:[%s4614_s5 + $0x6f8] sm:$0xf0]  ;;  %v4340_v32 = vld [vmem:[#allocation1 + $0x1b] sm:$0xff] }
  0xf9   : > { %2249 = vmatpush.bf16.msra.mxu3 %v3315_v11  ;;  %v5115_v4 = vadd.f32 %v1997_v0, %v1985_v63  ;;  %v4045_v11 = vld [vmem:[%s4614_s5 + $0x22c] sm:$0xf]  ;;  %v3840_v49 = vld [vmem:[%s4614_s5 + $0x7f8] sm:$0xf0]  ;;  %v3715_v52 = vor.u32 %v4197_v45, %v3712_v46 }
  0xfa   : > { %2211 = vmatpush.bf16.msra.mxu0 %v2915_v19  ;;  %v2832_v19 = vld [vmem:[%s4614_s5 + $0x18] sm:$0xf0]  ;;  %v4225_v58 = vld [vmem:[%s4614_s5 + $0x7cc] sm:$0xf] }
  0xfb   : > { %2224 = vmatpush.bf16.msra.mxu1 %v3043_v24  ;;  %v2979_v24 = vor.u32 %v4013_v8, %v2976_v10  ;;  %v3568_v55 = vld [vmem:[%s4614_s5 + $0x5d8] sm:$0xf0]  ;;  %v4125_v63 = vld [vmem:[%s4614_s5 + $0x4ac] sm:$0xf]  ;;  %v4341_v10 = vld [vmem:[#allocation1 + $0x9] sm:$0xff] }
  0xfc   : > { %2237 = vmatpush.bf16.msra.mxu2 %v3171_v25  ;;  %v3107_v25 = vor.u32 %v4045_v11, %v3104_v12  ;;  %v3696_v57 = vld [vmem:[%s4614_s5 + $0x6d8] sm:$0xf0]  ;;  %v4157_v1 = vld [vmem:[%s4614_s5 + $0x5ac] sm:$0xf] }
  0xfd   : > { %2250 = vmatpush.bf16.msra.mxu3 %v3299_v33  ;;  %v3699_v62 = vor.u32 %v4193_v56, %v3696_v57  ;;  %v3424_v0 = vld [vmem:[%s4614_s5 + $0x4b8] sm:$0xf0]  ;;  %v4221_v7 = vld [vmem:[%s4614_s5 + $0x7ac] sm:$0xf] }
  0xfe   : > { %2212 = vmatpush.bf16.msra.mxu0 %v2899_v40  ;;  %v1986_v33 = vpop.f32.mrf.mxu2  ;;  %v4133_v40 = vld [vmem:[%s4614_s5 + $0x4ec] sm:$0xf]  ;;  %v3552_v29 = vld [vmem:[%s4614_s5 + $0x5b8] sm:$0xf0] }
  0xff   : > { %2225 = vmatpush.bf16.msra.mxu1 %v3027_v42  ;;  %v1999_v39 = vpop.f32.mrf.mxu3  ;;  %v4165_v42 = vld [vmem:[%s4614_s5 + $0x5ec] sm:$0xf]  ;;  %v3459_v50 = vor.u32 %v4133_v40, %v3456_v41  ;;  %v3808_v31 = vld [vmem:[%s4614_s5 + $0x7b8] sm:$0xf0]  ;;  %v3555_v11 = vor.u32 %v4157_v1, %v3552_v29 }
 0x100   : > { %2238 = vmatpush.bf16.msra.mxu2 %v3155_v43  ;;  %v2835_v43 = vor.u32 %v3977_v18, %v2832_v19  ;;  %v3587_v22 = vor.u32 %v4165_v42, %v3584_v44  ;;  %v4339_v8 = vld [vmem:[#allocation1] sm:$0xff]  ;;  %v4121_v13 = vld [vmem:[%s4614_s5 + $0x48c] sm:$0xf]  ;;  %v3811_v18 = vor.u32 %v4221_v7, %v3808_v31 }
 0x101   : > { %2251 = vmatpush.bf16.msra.mxu3 %v3283_v48  ;;  %v4229_v48 = vld [vmem:[%s4614_s5 + $0x7ec] sm:$0xf]  ;;  %v3408_v14 = vld [vmem:[%s4614_s5 + $0x498] sm:$0xf0] }
 0x102   : > { %2213 = vmatpush.bf16.msra.mxu0 %v2883_v53  ;;  %v3440_v53 = vld [vmem:[%s4614_s5 + $0x4d8] sm:$0xf0]  ;;  %v4217_v27 = vld [vmem:[%s4614_s5 + $0x78c] sm:$0xf]  ;;  %v3411_v30 = vor.u32 %v4121_v13, %v3408_v14 }
 0x103   : > { %2226 = vmatpush.bf16.msra.mxu1 %v3011_v51  ;;  %v4161_v51 = vld [vmem:[%s4614_s5 + $0x5cc] sm:$0xf]  ;;  %v3443_v60 = vor.u32 %v4129_v26, %v3440_v53  ;;  %v3536_v19 = vld [vmem:[%s4614_s5 + $0x598] sm:$0xf0] }
 0x104   : > { %2239 = vmatpush.bf16.msra.mxu2 %v3139_v54  ;;  %v3843_v54 = vor.u32 %v4229_v48, %v3840_v49  ;;  %v3571_v61 = vor.u32 %v4161_v51, %v3568_v55  ;;  %v3792_v28 = vld [vmem:[%s4614_s5 + $0x798] sm:$0xf0]  ;;  %v4117_v36 = vld [vmem:[%s4614_s5 + $0x46c] sm:$0xf] }
 0x105   : > { %2252 = vmatpush.bf16.msra.mxu3 %v3267_v59  ;;  %v3824_v59 = vld [vmem:[%s4614_s5 + $0x7d8] sm:$0xf0]  ;;  %v4149_v39 = vld [vmem:[%s4614_s5 + $0x56c] sm:$0xf]  ;;  %v3795_v41 = vor.u32 %v4217_v27, %v3792_v28 }
 0x106   : > { %2214 = vmatpush.bf16.msra.mxu0 %v2867_v3  ;;  %v3827_v2 = vor.u32 %v4225_v58, %v3824_v59  ;;  %v4338_v3 = vld [vmem:[#allocation1 + $0x12] sm:$0xff]  ;;  %v3392_v37 = vld [vmem:[%s4614_s5 + $0x478] sm:$0xf0] }
 0x107   : > { %2227 = vmatpush.bf16.msra.mxu1 %v2995_v5  ;;  %v4189_v5 = vld [vmem:[%s4614_s5 + $0x6ac] sm:$0xf]  ;;  %v3520_v42 = vld [vmem:[%s4614_s5 + $0x578] sm:$0xf0] }
 0x108   : > { %2240 = vmatpush.bf16.msra.mxu2 %v3123_v6  ;;  %v3680_v6 = vld [vmem:[%s4614_s5 + $0x6b8] sm:$0xf0]  ;;  %v4213_v46 = vld [vmem:[%s4614_s5 + $0x76c] sm:$0xf]  ;;  %v3523_v48 = vor.u32 %v4149_v39, %v3520_v42 }
 0x109   : > { %2253 = vmatpush.bf16.msra.mxu3 %v3251_v9  ;;  %v3427_v9 = vor.u32 %v4125_v63, %v3424_v0  ;;  %v3683_v12 = vor.u32 %v4189_v5, %v3680_v6  ;;  %v3648_v44 = vld [vmem:[%s4614_s5 + $0x678] sm:$0xf0]  ;;  %v4177_v51 = vld [vmem:[%s4614_s5 + $0x64c] sm:$0xf] }
 0x10a   : > { %2215 = vmatpush.bf16.msra.mxu0 %v2851_v17  ;;  %v4153_v17 = vld [vmem:[%s4614_s5 + $0x58c] sm:$0xf]  ;;  %v3504_v53 = vld [vmem:[%s4614_s5 + $0x558] sm:$0xf0] }
 0x10b   : > { %2228 = vmatpush.bf16.msra.mxu1 %v2979_v24  ;;  %v4185_v24 = vld [vmem:[%s4614_s5 + $0x68c] sm:$0xf]  ;;  %v3760_v58 = vld [vmem:[%s4614_s5 + $0x758] sm:$0xf0] }
 0x10c   : > { %2241 = vmatpush.bf16.msra.mxu2 %v3107_v25  ;;  %v3664_v25 = vld [vmem:[%s4614_s5 + $0x698] sm:$0xf0]  ;;  %v4209_v57 = vld [vmem:[%s4614_s5 + $0x74c] sm:$0xf] }
 0x10d   : > { %2254 = vmatpush.bf16.msra.mxu3 %v3235_v34  ;;  %v3539_v34 = vor.u32 %v4153_v17, %v3536_v19  ;;  %v3667_v35 = vor.u32 %v4185_v24, %v3664_v25  ;;  %v4109_v0 = vld [vmem:[%s4614_s5 + $0x42c] sm:$0xf]  ;;  %v3360_v1 = vld [vmem:[%s4614_s5 + $0x438] sm:$0xf0]  ;;  %v3763_v29 = vor.u32 %v4209_v57, %v3760_v58 }
 0x10e   : > { %2216 = vmatpush.bf16.msra.mxu0 %v2835_v43  ;;  %v2010_v33 = vpop.f32.mrf.mxu0  ;;  %v4181_v43 = vld [vmem:[%s4614_s5 + $0x66c] sm:$0xf]  ;;  %v3488_v5 = vld [vmem:[%s4614_s5 + $0x538] sm:$0xf0] }
 0x10f   : > { %2229 = vmatpush.bf16.msra.mxu1 %v2963_v47  ;;  %v2023_v40 = vpop.f32.mrf.mxu1  ;;  %v3776_v47 = vld [vmem:[%s4614_s5 + $0x778] sm:$0xf0]  ;;  %v3651_v49 = vor.u32 %v4181_v43, %v3648_v44  ;;  %v4173_v6 = vld [vmem:[%s4614_s5 + $0x62c] sm:$0xf] }
 0x110   : > { %2242 = vmatpush.bf16.msra.mxu2 %v3091_v20  ;;  %v2024_v45 = vadd.f32 %v2023_v40, %v2010_v33  ;;  %v3395_v20 = vor.u32 %v4117_v36, %v3392_v37  ;;  %v3779_v26 = vor.u32 %v4213_v46, %v3776_v47  ;;  %v3616_v7 = vld [vmem:[%s4614_s5 + $0x638] sm:$0xf0]  ;;  %v4205_v31 = vld [vmem:[%s4614_s5 + $0x72c] sm:$0xf] }
 0x111   : > { %2255 = vmatpush.bf16.msra.mxu3 %v3219_v21  ;;  %2217 = vmatmul.bf16.vlgmr.msra.gmra.mxu0 %v4339_v8  ;;  %v4113_v21 = vld [vmem:[%s4614_s5 + $0x44c] sm:$0xf]  ;;  %v3744_v8 = vld [vmem:[%s4614_s5 + $0x738] sm:$0xf0] }
 0x112   : > { %2261 = vmatpush.bf16.msrb.mxu0 %v3459_v50  ;;  %2230 = vmatmul.bf16.vlgmr.msra.gmra.mxu1 %v4341_v10  ;;  %v3376_v50 = vld [vmem:[%s4614_s5 + $0x458] sm:$0xf0]  ;;  %v3619_v10 = vor.u32 %v4173_v6, %v3616_v7  ;;  %v4137_v13 = vld [vmem:[%s4614_s5 + $0x50c] sm:$0xf]  ;;  %v3747_v17 = vor.u32 %v4205_v31, %v3744_v8  ;;  %v4237_v7 = vld [vmem:[%s5216_s8 + $0x28] sm:$0xff] }
 0x113   : > { %2274 = vmatpush.bf16.msrb.mxu1 %v3587_v22  ;;  %2243 = vmatmul.bf16.vlgmr.msra.gmra.mxu2 %v4338_v3  ;;  %v4145_v22 = vld [vmem:[%s4614_s5 + $0x54c] sm:$0xf]  ;;  %v3379_v59 = vor.u32 %v4113_v21, %v3376_v50  ;;  %v3600_v24 = vld [vmem:[%s4614_s5 + $0x618] sm:$0xf0]  ;;  %v4245_v31 = vld [vmem:[%s5216_s8 + $0x68] sm:$0xff] }
 0x114   : > { %2287 = vmatpush.bf16.msrb.mxu2 %v3715_v52  ;;  %2256 = vmatmul.bf16.vlgmr.msra.gmra.mxu3 %v4340_v32  ;;  %v3363_v32 = vor.u32 %v4109_v0, %v3360_v1  ;;  %v4169_v19 = vld [vmem:[%s4614_s5 + $0x60c] sm:$0xf]  ;;  %v3728_v28 = vld [vmem:[%s4614_s5 + $0x718] sm:$0xf0]  ;;  %v4253_v8 = vld [vmem:[%s5216_s8 + $0xa8] sm:$0xff] }
 0x115   : > { %2300 = vmatpush.bf16.msrb.mxu3 %v3843_v54  ;;  %v3632_v54 = vld [vmem:[%s4614_s5 + $0x658] sm:$0xf0]  ;;  %v4201_v27 = vld [vmem:[%s4614_s5 + $0x70c] sm:$0xf] }
 0x116   : > { %2262 = vmatpush.bf16.msrb.mxu0 %v3443_v60  ;;  %v2036_v52 = vpop.f32.mrf.mxu2  ;;  %v3635_v63 = vor.u32 %v4177_v51, %v3632_v54  ;;  %v4238_v1 = vld [vmem:[%s5216_s8 + $0x30] sm:$0xff] }
 0x117   : > { %2275 = vmatpush.bf16.msrb.mxu1 %v3571_v61  ;;  %v2037_v55 = vadd.f32 %v2036_v52, %v2024_v45  ;;  %v2049_v56 = vpop.f32.mrf.mxu3  ;;  %v2012_v61 = vpop.f32.mrf.mxu0 }
 0x118   : > { %2288 = vmatpush.bf16.msrb.mxu2 %v3699_v62  ;;  %v3507_v62 = vor.u32 %v4145_v22, %v3504_v53  ;;  %v2025_v3 = vpop.f32.mrf.mxu1  ;;  %v4255_v61 = vld [vmem:[%s5216_s8 + $0xb8] sm:$0xff] }
 0x119   : > { %2301 = vmatpush.bf16.msrb.mxu3 %v3827_v2  ;;  %v2050_v60 = vadd.f32 %v2049_v56, %v2037_v55  ;;  %v4141_v2 = vld [vmem:[%s4614_s5 + $0x52c] sm:$0xf]  ;;  %v4254_v3 = vld [vmem:[%s5216_s8 + $0xb0] sm:$0xff] }
 0x11a   : > { %2263 = vmatpush.bf16.msrb.mxu0 %v3427_v9  ;;  %v3491_v9 = vor.u32 %v4141_v2, %v3488_v5  ;;  %v4246_v2 = vld [vmem:[%s5216_s8 + $0x70] sm:$0xff] }
 0x11b   : > { %2276 = vmatpush.bf16.msrb.mxu1 %v3555_v11  ;;  %v4105_v11 = vld [vmem:[%s4614_s5 + $0x40c] sm:$0xf] }
 0x11c   : > { %2289 = vmatpush.bf16.msrb.mxu2 %v3683_v12  ;;  %v3344_v12 = vld [vmem:[%s4614_s5 + $0x418] sm:$0xf0] }
 0x11d   : > { %2302 = vmatpush.bf16.msrb.mxu3 %v3811_v18  ;;  %v3472_v18 = vld [vmem:[%s4614_s5 + $0x518] sm:$0xf0] }
 0x11e   : > { %2264 = vmatpush.bf16.msrb.mxu0 %v3411_v30  ;;  %v2038_v14 = vpop.f32.mrf.mxu2  ;;  %v3347_v30 = vor.u32 %v4105_v11, %v3344_v12  ;;  %v3475_v33 = vor.u32 %v4137_v13, %v3472_v18  ;;  %v4236_v11 = vld [vmem:[%s5216_s8 + $0x20] sm:$0xff] }
 0x11f   : > { %2277 = vmatpush.bf16.msrb.mxu1 %v3539_v34  ;;  %v2051_v25 = vpop.f32.mrf.mxu3  ;;  %v3603_v34 = vor.u32 %v4169_v19, %v3600_v24  ;;  %v4244_v12 = vld [vmem:[%s5216_s8 + $0x60] sm:$0xff]  ;;  %v4235_v19 = vld [vmem:[%s5216_s8 + $0x18] sm:$0xff] }
 0x120   : > { %2290 = vmatpush.bf16.msrb.mxu2 %v3667_v35  ;;  %v3731_v35 = vor.u32 %v4201_v27, %v3728_v28  ;;  %v4252_v13 = vld [vmem:[%s5216_s8 + $0xa0] sm:$0xff]  ;;  %v4243_v24 = vld [vmem:[%s5216_s8 + $0x58] sm:$0xff] }
 0x121   : > { %2303 = vmatpush.bf16.msrb.mxu3 %v3795_v41  ;;  %v4260_v14 = vld [vmem:[%s5216_s8 + $0xe0] sm:$0xff]  ;;  %v4251_v25 = vld [vmem:[%s5216_s8 + $0x98] sm:$0xff] }
 0x122   : > { %2265 = vmatpush.bf16.msrb.mxu0 %v3395_v20  ;;  %v4259_v27 = vld [vmem:[%s5216_s8 + $0xd8] sm:$0xff] }
 0x123   : > { %2278 = vmatpush.bf16.msrb.mxu1 %v3523_v48 }
 0x124   : > { %2291 = vmatpush.bf16.msrb.mxu2 %v3651_v49 }
 0x125   : > { %2304 = vmatpush.bf16.msrb.mxu3 %v3779_v26 }
 0x126   : > { %2266 = vmatpush.bf16.msrb.mxu0 %v3379_v59  ;;  %v4239_v59 = vld [vmem:[%s5216_s8 + $0x38] sm:$0xff] }
 0x127   : > { %2279 = vmatpush.bf16.msrb.mxu1 %v3507_v62 }
 0x128   : > { %2292 = vmatpush.bf16.msrb.mxu2 %v3635_v63  ;;  %v4263_v63 = vld [vmem:[%s5216_s8 + $0xf8] sm:$0xff] }
 0x129   : > { %2305 = vmatpush.bf16.msrb.mxu3 %v3763_v29  ;;  %v4262_v29 = vld [vmem:[%s5216_s8 + $0xf0] sm:$0xff] }
 0x12a   : > { %2267 = vmatpush.bf16.msrb.mxu0 %v3363_v32  ;;  %v4261_v32 = vld [vmem:[%s5216_s8 + $0xe8] sm:$0xff] }
 0x12b   : > { %2280 = vmatpush.bf16.msrb.mxu1 %v3491_v9 }
 0x12c   : > { %2293 = vmatpush.bf16.msrb.mxu2 %v3619_v10 }
 0x12d   : > { %2306 = vmatpush.bf16.msrb.mxu3 %v3747_v17 }
 0x12e   : > { %2268 = vmatpush.bf16.msrb.mxu0 %v3347_v30  ;;  %v2062_v36 = vpop.f32.mrf.mxu0 }
 0x12f   : > { %2281 = vmatpush.bf16.msrb.mxu1 %v3475_v33  ;;  %v2063_v37 = vadd.f32 %v2062_v36, %v2050_v60  ;;  %v2075_v39 = vpop.f32.mrf.mxu1  ;;  %v4247_v60 = vld [vmem:[%s5216_s8 + $0x78] sm:$0xff]  ;;  %v4234_v33 = vld [vmem:[%s5216_s8 + $0x10] sm:$0xff] }
 0x130   : > { %2294 = vmatpush.bf16.msrb.mxu2 %v3603_v34  ;;  %v4242_v34 = vld [vmem:[%s5216_s8 + $0x50] sm:$0xff] }
 0x131   : > { %2307 = vmatpush.bf16.msrb.mxu3 %v3731_v35  ;;  %2269 = vmatmul.bf16.vlgmr.msrb.gmra.mxu0 %v5079_v15  ;;  %v2076_v40 = vadd.f32 %v2075_v39, %v2063_v37  ;;  %v4250_v35 = vld [vmem:[%s5216_s8 + $0x90] sm:$0xff]  ;;  %v4233_v37 = vld [vmem:[%s5216_s8 + $0x8] sm:$0xff] }
 0x132   : > { %2282 = vmatmul.bf16.vlgmr.msrb.gmra.mxu1 %v5087_v23  ;;  %2618 = vmatpush.bf16.msra.mxu0 %v4239_v59  ;;  %v4258_v36 = vld [vmem:[%s5216_s8 + $0xd0] sm:$0xff]  ;;  %v4241_v39 = vld [vmem:[%s5216_s8 + $0x48] sm:$0xff] }
 0x133   : > { %2295 = vmatmul.bf16.vlgmr.msrb.gmra.mxu2 %v5073_v38  ;;  %2631 = vmatpush.bf16.msra.mxu1 %v4247_v60 }
 0x134   : > { %2308 = vmatmul.bf16.vlgmr.msrb.gmra.mxu3 %v5082_v16  ;;  %2644 = vmatpush.bf16.msra.mxu2 %v4255_v61 }
 0x135   : > { %2657 = vmatpush.bf16.msra.mxu3 %v4263_v63 }
 0x136   : > { %v2088_v41 = vpop.f32.mrf.mxu2  ;;  %v2064_v45 = vpop.f32.mrf.mxu0  ;;  %2619 = vmatpush.bf16.msra.mxu0 %v4238_v1 }
 0x137   : > { %v2089_v42 = vadd.f32 %v2088_v41, %v2076_v40  ;;  %v2101_v43 = vpop.f32.mrf.mxu3  ;;  %v2077_v46 = vpop.f32.mrf.mxu1  ;;  %2632 = vmatpush.bf16.msra.mxu1 %v4246_v2  ;;  %v4249_v40 = vld [vmem:[%s5216_s8 + $0x88] sm:$0xff]  ;;  %v4248_v45 = vld [vmem:[%s5216_s8 + $0x80] sm:$0xff] }
 0x138   : > { %2645 = vmatpush.bf16.msra.mxu2 %v4254_v3  ;;  %v4257_v41 = vld [vmem:[%s5216_s8 + $0xc8] sm:$0xff]  ;;  %v4256_v46 = vld [vmem:[%s5216_s8 + $0xc0] sm:$0xff] }
 0x139   : > { %v2102_v44 = vadd.f32 %v2101_v43, %v2089_v42  ;;  %2658 = vmatpush.bf16.msra.mxu3 %v4262_v29  ;;  %v4232_v43 = vld [vmem:[%s5216_s8] sm:$0xff] }
 0x13a   : > { %2620 = vmatpush.bf16.msra.mxu0 %v4237_v7 }
 0x13b   : > { %v2317_v47 = vrot.slane %v2102_v44, 6  ;;  %2633 = vmatpush.bf16.msra.mxu1 %v4245_v31  ;;  %v4240_v44 = vld [vmem:[%s5216_s8 + $0x40] sm:$0xff] }
 0x13c   : > { %2646 = vmatpush.bf16.msra.mxu2 %v4253_v8 }
 0x13d   : > { %v5203_v15 = vsel %vm2320_vm0, %v5115_v4, %v2317_v47  ;;  %2659 = vmatpush.bf16.msra.mxu3 %v4261_v32 }
 0x13e   : > { %v2090_v23 = vpop.f32.mrf.mxu2  ;;  %2621 = vmatpush.bf16.msra.mxu0 %v4236_v11 }
 0x13f   : > { %v2103_v38 = vpop.f32.mrf.mxu3  ;;  %2634 = vmatpush.bf16.msra.mxu1 %v4244_v12 }
 0x140   : > { %2647 = vmatpush.bf16.msra.mxu2 %v4252_v13  ;;  %v2333_v38 = vld [vmem:[%s4623_s13] sm:$0xf] }
 0x141   : > { %2660 = vmatpush.bf16.msra.mxu3 %v4260_v14 }
 0x142   : > { %2622 = vmatpush.bf16.msra.mxu0 %v4235_v19 }
 0x143   : > { %2635 = vmatpush.bf16.msra.mxu1 %v4243_v24 }
 0x144   : > { %2648 = vmatpush.bf16.msra.mxu2 %v4251_v25 }
 0x145   : > { %2661 = vmatpush.bf16.msra.mxu3 %v4259_v27 }
 0x146   : > { %2623 = vmatpush.bf16.msra.mxu0 %v4234_v33 }
 0x147   : > { %2636 = vmatpush.bf16.msra.mxu1 %v4242_v34 }
 0x148   : > { %2649 = vmatpush.bf16.msra.mxu2 %v4250_v35 }
 0x149   : > { %2662 = vmatpush.bf16.msra.mxu3 %v4258_v36 }
 0x14a   : > { %2624 = vmatpush.bf16.msra.mxu0 %v4233_v37 }
 0x14b   : > { %2637 = vmatpush.bf16.msra.mxu1 %v4241_v39 }
 0x14c   : > { %2650 = vmatpush.bf16.msra.mxu2 %v4249_v40 }
 0x14d   : > { %2663 = vmatpush.bf16.msra.mxu3 %v4257_v41 }
 0x14e   : > { %v2114_v16 = vpop.f32.mrf.mxu0  ;;  %2625 = vmatpush.bf16.msra.mxu0 %v4232_v43 }
 0x14f   : > { %v2127_v20 = vpop.f32.mrf.mxu1  ;;  %2638 = vmatpush.bf16.msra.mxu1 %v4240_v44 }
 0x150   : > { %v2128_v48 = vadd.f32 %v2127_v20, %v2114_v16  ;;  %2651 = vmatpush.bf16.msra.mxu2 %v4248_v45 }
 0x151   : > { %2664 = vmatpush.bf16.msra.mxu3 %v4256_v46 }
 0x156   : > { %v2140_v49 = vpop.f32.mrf.mxu2  ;;  %v2116_v52 = vpop.f32.mrf.mxu0 }
 0x157   : > { %v2141_v21 = vadd.f32 %v2140_v49, %v2128_v48  ;;  %v2153_v50 = vpop.f32.mrf.mxu3  ;;  %v2129_v26 = vpop.f32.mrf.mxu1  ;;  %v2337_v52 = vperm.slane %v2333_v38, 2 }
 0x158   : > { %v2338_v26 = vperm.slane %v2333_v38, 3 }
 0x159   : > { %v5205_v22 = vadd.f32 %v2153_v50, %v2141_v21  ;;  %v2336_v21 = vperm.slane %v2333_v38, 1 }
 0x15e   : > { %v2142_v53 = vpop.f32.mrf.mxu2 }
 0x15f   : > { %v2155_v51 = vpop.f32.mrf.mxu3 }
 0x160   : > { %v2335_v51 = vperm.slane %v2333_v38, 0 }
 0x16e   : > { %v5207_v54 = vpop.f32.mrf.mxu0 }
 0x16f   : > { %v5209_v55 = vpop.f32.mrf.mxu1  ;;  %v2167_v47 = vadd.f32 %v5207_v54, %v5205_v22  ;;  %v2340_v54 = vrot.slane %v2337_v52, 4 }
 0x171   : > { %v2180_v16 = vadd.f32 %v5209_v55, %v2167_v47 }
 0x176   : > { %v5211_v4 = vpop.f32.mrf.mxu2  ;;  %v2168_v57 = vpop.f32.mrf.mxu0 }
 0x177   : > { %v5213_v56 = vpop.f32.mrf.mxu3  ;;  %v2181_v58 = vpop.f32.mrf.mxu1  ;;  %v2193_v53 = vadd.f32 %v5211_v4, %v2180_v16  ;;  %v2339_v57 = vrot.slane %v2336_v21, 6 }
 0x178   : > { %v2341_v58 = vrot.slane %v2338_v26, 2 }
 0x179   : > { %v2206_v60 = vadd.f32 %v5213_v56, %v2193_v53 }
 0x17a   : > { %v2343_v2 = vsel %vm2322_vm1, %v2340_v54, %v2341_v58 }
 0x17b   : > { %v2318_v3 = vrot.slane %v2206_v60, 4 }
 0x17e   : > { %v2194_v62 = vpop.f32.mrf.mxu2 }
 0x17f   : > { %v2207_v0 = vpop.f32.mrf.mxu3 }
 0x180   : > { %v2342_v0 = vsel %vm2320_vm0, %v2335_v51, %v2339_v57 }
 0x181   : > { %v2344_v29 = vsel %vm2324_vm2, %v2342_v0, %v2343_v2 }
 0x18e   : > { %v2218_v5 = vpop.f32.mrf.mxu0 }
 0x18f   : > { %v2231_v6 = vpop.f32.mrf.mxu1 }
 0x190   : > { %v2232_v42 = vadd.f32 %v2231_v6, %v2218_v5 }
 0x196   : > { %v2244_v9 = vpop.f32.mrf.mxu2  ;;  %v2220_v17 = vpop.f32.mrf.mxu0 }
 0x197   : > { %v2257_v10 = vpop.f32.mrf.mxu3  ;;  %v2233_v18 = vpop.f32.mrf.mxu1  ;;  %v2245_v23 = vadd.f32 %v2244_v9, %v2232_v42 }
 0x199   : > { %v2258_v20 = vadd.f32 %v2257_v10, %v2245_v23 }
 0x19e   : > { %v2246_v28 = vpop.f32.mrf.mxu2 }
 0x19f   : > { %v2259_v30 = vpop.f32.mrf.mxu3 }
 0x1ae   : > { %v2270_v48 = vpop.f32.mrf.mxu0 }
 0x1af   : > { %v2283_v49 = vpop.f32.mrf.mxu1  ;;  %v2271_v50 = vadd.f32 %v2270_v48, %v2258_v20 }
 0x1b1   : > { %v2284_v22 = vadd.f32 %v2283_v49, %v2271_v50 }
 0x1b6   : > { %v2296_v59 = vpop.f32.mrf.mxu2  ;;  %v2272_v62 = vpop.f32.mrf.mxu0 }
 0x1b7   : > { %v2297_v61 = vadd.f32 %v2296_v59, %v2284_v22  ;;  %v2309_v55 = vpop.f32.mrf.mxu3  ;;  %v2285_v63 = vpop.f32.mrf.mxu1 }
 0x1b9   : > { %v2310_v1 = vadd.f32 %v2309_v55, %v2297_v61 }
 0x1bb   : > { %v2319_v4 = vrot.slane %v2310_v1, 2 }
 0x1bd   : > { %v2323_v5 = vsel %vm2322_vm1, %v2318_v3, %v2319_v4 }
 0x1be   : > { %v2325_v6 = vsel %vm2324_vm2, %v5203_v15, %v2323_v5  ;;  %v2298_v7 = vpop.f32.mrf.mxu2 }
 0x1bf   : > { %v2346_v31 = vadd.f32 %v2344_v29, %v2325_v6  ;;  %v2311_v8 = vpop.f32.mrf.mxu3 }
 0x1c1   : > { %v2347_v56 = vmax.f32 %v2346_v31, 0.0 }
 0x1c3   : > { %2349 = vst [vmem:[#allocation1] ss:$4 sm:$0xff] %v2347_v56 }
 0x1ca   : > { %v2350_v32 = vld.sshfl [vmem:[#allocation1] sm:$0xff pattern:$0x73625140]  ;;  %v2351_v9 = vld.sshfl [vmem:[#allocation1 + $0x8] sm:$0xff pattern:$0x73625140] }
 0x1cb   : > { %v2358_v10 = vpack.c.bf16 %v2350_v32, %v2350_v32  ;;  %v2359_v11 = vpack.c.bf16 %v2351_v9, %v2351_v9  ;;  %v2352_v12 = vld.sshfl [vmem:[#allocation1 + $0x10] sm:$0xff pattern:$0x73625140]  ;;  %v2353_v13 = vld.sshfl [vmem:[#allocation1 + $0x18] sm:$0xff pattern:$0x73625140] }
 0x1cc   : > { %v2360_v14 = vpack.c.bf16 %v2352_v12, %v2352_v12  ;;  %v2361_v17 = vpack.c.bf16 %v2353_v13, %v2353_v13 }
 0x1cd   : > { %2626 = vmatmul.bf16.vlgmr.msra.gmra.mxu0 %v2358_v10  ;;  %2639 = vmatmul.bf16.vlgmr.msra.gmra.mxu1 %v2359_v11 }
 0x1ce   : > { %2652 = vmatmul.bf16.vlgmr.msra.gmra.mxu2 %v2360_v14  ;;  %2665 = vmatmul.bf16.vlgmr.msra.gmra.mxu3 %v2361_v17 }
 0x24a   : > { %v2627_v15 = vpop.f32.mrf.mxu0  ;;  %v2640_v18 = vpop.f32.mrf.mxu1 }
 0x24b   : > { %v2641_v19 = vadd.f32 %v2640_v18, %v2627_v15 }
 0x251   : > { %v2653_v24 = vpop.f32.mrf.mxu2  ;;  %v2666_v25 = vpop.f32.mrf.mxu3 }
 0x252   : > { %v2654_v27 = vadd.f32 %v2653_v24, %v2641_v19  ;;  %v2629_v28 = vpop.f32.mrf.mxu0  ;;  %v2642_v30 = vpop.f32.mrf.mxu1 }
 0x254   : > { %v2667_v33 = vadd.f32 %v2666_v25, %v2654_v27 }
 0x256   : > { %2670 = vst [vmem:[%s335_s12] sm:$0x3] %v2667_v33 }
 0x259   : > { %v2655_v34 = vpop.f32.mrf.mxu2  ;;  %v2668_v35 = vpop.f32.mrf.mxu3 }
 0x25a PF: > { %s20_s20 = sadd.s32 1, %s4486_s20   ;;  %s5296_s18 = sld [smem:[#allocation11_spill]] }
 0x25b   : > { %p17_p0 = scmp.ge.s32.totalorder %s20_s20, 4   ;;  %s5297_s29 = sld [smem:[#allocation10_spill]] }
 0x25c   : > { %s5298_s15 = smov %s4470_s16  ;;  %s5299_s16 = smov %s4474_s17 }
 0x25d   :  { %19 = sbr.rel (!%p17_p0) target bundleno = 8 (0x8), region = 111 }
 0x260   : > { %s5300_s17 = smov %s5296_s18  ;;  %s5301_s18 = smov %s4482_s19 }
 0x261   : > { %s5302_s19 = smov %s5297_s29 }
 0x262   :  { %2690 = vsyncpa [#allocation4], 1 }
 0x263   :  { %2692 = vsyncpa [#allocation4 + $0x1], 1 }
 0x264   :  { %2693 = vsyncpa [#allocation6], 1 }
 0x265   :  { %2695 = vsyncpa [#allocation6 + $0x1], 1 }

</bundles_post_ra>
